<compile_context>
chip_gen: v5e
topology: v5e:2x2
jax: 0.10.0
libtpu: 0.0.40
codegen_flags: <defaults>
</compile_context>

<pallas_src>
import numpy as np
import jax
import jax.numpy as jnp
from jax.experimental import pallas as pl
from jax.experimental.pallas import tpu as pltpu

HIDDEN = 512          # cpb_mlp hidden width: nn.Linear(2, 512)
COL_TILE = 512        # lane-dense column tile for the gather/pad matmul
_MB = 1 << 20


def _vmem_limit(working_bytes):
    """Explicit scoped-VMEM request with headroom; stays v7x-safe (<= 48 MiB)."""
    return int(min(max(4 * working_bytes + 4 * _MB, 8 * _MB), 48 * _MB))


# ---------------------------------------------------------------------------
# Kernel A (one-time / cacheable): fused bias-table construction.
# Weights are passed in native torch layout: W1 (512,2), b1 (512,1), W2 (H,512).
# ---------------------------------------------------------------------------
def _bias_table_kernel(coords_t_ref, w1_ref, b1_ref, w2_ref, gpad_ref, out_ref):
    ct = coords_t_ref[...]                              # (2, T)
    w1 = w1_ref[...]                                    # (512, 2)
    hidden = (w1[:, 0:1] * ct[0:1, :]
              + w1[:, 1:2] * ct[1:2, :]
              + b1_ref[...])                            # (512, T)
    hidden = jnp.maximum(hidden, 0.0)                   # ReLU
    table_t = jnp.dot(w2_ref[...], hidden,
                      preferred_element_type=jnp.float32)      # (H, T)
    sig = 16.0 * jax.nn.sigmoid(table_t)                # float32 (exact gather)
    # Gather + zero-pad folded into a one-hot matmul over one lane-dense
    # column tile.  MXU M=H is tiny, but this kernel runs once and is cached.
    # TODO(synk): for very large windows replace the one-hot matmul with a
    # scalar-prefetch / jnp.take gather to avoid DMA-ing a mostly-zero matrix.
    out_ref[...] = jnp.dot(sig, gpad_ref[...],
                           preferred_element_type=jnp.float32)  # (H, TN)


def compute_pos_bias(coords_table, w1, b1, w2, gpad, seq_length):
    """Build the post-sigmoid, zero-padded bias (H, S, S), float32.

    Input-independent -> compute once and cache (deploy path); the per-step
    cost is then only the broadcast add (Kernel B).
    """
    T = coords_table.shape[0]
    H = w2.shape[0]
    S = seq_length
    SS = S * S
    SP = gpad.shape[1]                      # column count, padded to COL_TILE
    tn = min(COL_TILE, SP)
    assert SP % tn == 0 and tn % 128 == 0
    coords_t = coords_table.T               # (2, T), one-time tiny op
    b1c = b1.reshape(HIDDEN, 1)
    working = 4 * (2 * T + HIDDEN * 2 + HIDDEN + H * HIDDEN + T * tn + H * tn)
    bias_flat = pl.pallas_call(
        _bias_table_kernel,
        out_shape=jax.ShapeDtypeStruct((H, SP), jnp.float32),
        grid=(SP // tn,),                    # tiled over lane-dense column blocks
        in_specs=[
            pl.BlockSpec((2, T), lambda j: (0, 0)),
            pl.BlockSpec((HIDDEN, 2), lambda j: (0, 0)),
            pl.BlockSpec((HIDDEN, 1), lambda j: (0, 0)),
            pl.BlockSpec((H, HIDDEN), lambda j: (0, 0)),
            pl.BlockSpec((T, tn), lambda j: (0, j)),
        ],
        out_specs=pl.BlockSpec((H, tn), lambda j: (0, j)),
        compiler_params=pltpu.CompilerParams(
            dimension_semantics=("parallel",),
            vmem_limit_bytes=_vmem_limit(working)),
    )(coords_t, w1, b1c, w2, gpad)
    return bias_flat[:, :SS].reshape(H, S, S)


# ---------------------------------------------------------------------------
# Kernel B (per-forward hot path): out[b] = x[b] + bias   (pure VPU add)
# ---------------------------------------------------------------------------
def _bias_add_kernel(x_ref, bias_ref, o_ref):
    # x_ref: (Bt, H, S*S), bias_ref: (H, S*S) -- lane-dense last dim.
    o_ref[...] = (x_ref[...] + bias_ref[...][None]).astype(o_ref.dtype)


def _choose_bt(B, per_batch_bytes, target_bytes=2 * _MB):
    """Batch-chunk size: ~2 MB per grid step, but keep >= 2 steps when B >= 2
    (v7x has 2 TensorCores per chip; neutral on v5e/v6e)."""
    bt = max(1, min(B, target_bytes // max(per_batch_bytes, 1)))
    if B >= 2:
        bt = min(bt, max(1, B // 2))
    while B % bt:
        bt -= 1
    return int(bt)


def _make_add_call(B, H, SS, Bt, dtype, vmem_bytes, donate, single_buffer_bias):
    bias_kwargs = dict(pipeline_mode=pl.Buffered(1)) if single_buffer_bias else {}
    return pl.pallas_call(
        _bias_add_kernel,
        out_shape=jax.ShapeDtypeStruct((B, H, SS), dtype),
        grid=(B // Bt,),
        in_specs=[
            pl.BlockSpec((Bt, H, SS), lambda b: (b, 0, 0)),
            pl.BlockSpec((H, SS), lambda b: (0, 0), **bias_kwargs),  # resident
        ],
        out_specs=pl.BlockSpec((Bt, H, SS), lambda b: (b, 0, 0)),
        input_output_aliases=({0: 0} if donate else {}),
        compiler_params=pltpu.CompilerParams(
            dimension_semantics=("parallel",),
            vmem_limit_bytes=vmem_bytes),
    )


def add_pos_bias(x, bias, *, donate=False):
    """out[b] = x[b] + bias, with x viewed as (B, H, S*S) for lane-dense stores.

    Set donate=True (input_output_aliases={0: 0}) when x is dead after the add
    so its HBM buffer is reused for the output.
    TODO(synk): in a full attention block, fuse this add into the kernel that
    consumes the logits (e.g. flash attention) to remove the HBM round trip.
    """
    B, H, S1, S2 = x.shape
    SS = S1 * S2
    xf = x.reshape(B, H, SS)                      # free relayout (row-major)
    bf = bias.reshape(H, SS).astype(x.dtype)      # cached bias kept in x.dtype
    per_batch = H * SS * x.dtype.itemsize
    Bt = _choose_bt(B, per_batch)
    working = 2 * Bt * per_batch + 2 * H * SS * x.dtype.itemsize
    vmem = _vmem_limit(working)
    try:
        # Grid-invariant bias: request single buffering (halves its VMEM).
        out = _make_add_call(B, H, SS, Bt, x.dtype, vmem, donate, True)(xf, bf)
    except Exception:
        # Fallback if this Pallas build rejects Buffered(1) on pallas_call.
        out = _make_add_call(B, H, SS, Bt, x.dtype, vmem, donate, False)(xf, bf)
    return out.reshape(B, H, S1, S2)


# ---------------------------------------------------------------------------
# Static buffer construction (matches the PyTorch __init__ exactly)
# ---------------------------------------------------------------------------
def build_buffers(window_size, pretrained_window_size, no_log=False):
    Wh, Ww = window_size
    rel_h = np.arange(-(Wh - 1), Wh, dtype=np.float32)
    rel_w = np.arange(-(Ww - 1), Ww, dtype=np.float32)
    gh, gw = np.meshgrid(rel_h, rel_w, indexing="ij")
    table = np.stack([gh, gw], axis=-1)                   # (2Wh-1, 2Ww-1, 2)
    if pretrained_window_size[0] > 0:
        table[..., 0] /= pretrained_window_size[0] - 1
        table[..., 1] /= pretrained_window_size[1] - 1
    else:
        table[..., 0] /= Wh - 1
        table[..., 1] /= Ww - 1
    if not no_log:
        table *= 8
        table = np.sign(table) * np.log2(np.abs(table) + 1.0) / np.log2(8)
    coords_table = table.reshape(-1, 2).astype(np.float32)    # (T, 2)

    ch = np.arange(Wh)
    cw = np.arange(Ww)
    gh, gw = np.meshgrid(ch, cw, indexing="ij")
    coords_flat = np.stack([gh.ravel(), gw.ravel()])           # (2, N)
    rel = coords_flat[:, :, None] - coords_flat[:, None, :]    # (2, N, N)
    rel = rel.transpose(1, 2, 0).copy()
    rel[..., 0] += Wh - 1
    rel[..., 1] += Ww - 1
    rel[..., 0] *= 2 * Ww - 1
    rel_pos_index = rel.sum(-1).astype(np.int32)               # (N, N)
    return coords_table, rel_pos_index


def build_gather_pad_matrix(rel_pos_index, num_table_entries, seq_length,
                            local_window_size, col_tile=COL_TILE):
    """(T, SP) one-hot matrix, SP = S*S padded up to a multiple of `col_tile`.
    Column r*S+c picks table row rel_pos_index[r-g, c-g] for local positions;
    padded global/CT rows & columns (and the SP-S*S tail) are all-zero, so the
    zero pad is applied AFTER the sigmoid, exactly as in the torch module."""
    N = rel_pos_index.shape[0]
    S = seq_length
    SS = S * S
    SP = int(np.ceil(SS / col_tile)) * col_tile
    g = S - local_window_size
    rows = rel_pos_index.reshape(-1)
    ii, jj = np.meshgrid(np.arange(N), np.arange(N), indexing="ij")
    cols = ((ii + g) * S + (jj + g)).reshape(-1)
    G = np.zeros((num_table_entries, SP), dtype=np.float32)   # keep float32
    G[rows, cols] = 1.0
    return jnp.asarray(G)


# ---------------------------------------------------------------------------
# Forward (ct_correct=False, non-deploy path). Pass `pos_emb` to reuse the
# cached bias (deploy-like steady state: per-step cost is the add only).
# ---------------------------------------------------------------------------
def pos_emb_mlp_swinv2d_forward(x, local_window_size, coords_table, gpad,
                                w1, b1, w2, pos_emb=None):
    # TODO(synk): ct_correct=True CT-token row/col reshuffle not implemented
    # (module default ct_correct=False path is fully reproduced).
    # TODO(synk): no custom VJP through the bias build; if cpb_mlp weights are
    # trained, build the bias in plain XLA under autodiff and cache the result.
    del local_window_size  # padding offset is baked into `gpad` at build time
    S = x.shape[2]
    if pos_emb is None:
        pos_emb = compute_pos_bias(coords_table, w1, b1, w2, gpad, S)
    return add_pos_bias(x, pos_emb)


# ---------------------------------------------------------------------------
# Pure-JAX reference for verification (torch math, torch weight layout)
# ---------------------------------------------------------------------------
def ref_forward(x, local_window_size, window_size,
                coords_table, rel_pos_index, w1, b1, w2):
    Wh, Ww = window_size
    N = Wh * Ww
    S = x.shape[2]
    h = jnp.maximum(coords_table @ w1.T + b1, 0.0)          # (T, 512)
    table = h @ w2.T                                        # (T, H)
    bias = table[rel_pos_index.reshape(-1)].reshape(N, N, -1).transpose(2, 0, 1)
    bias = 16.0 * jax.nn.sigmoid(bias)
    g = S - local_window_size
    bias = jnp.pad(bias, ((0, 0), (g, 0), (g, 0)))
    return x + bias[None]


if __name__ == "__main__":
    # Small config: window 4x4 -> local seq 16, 4 global (CT) tokens -> S = 20
    window_size = (4, 4)
    pretrained_window_size = (0, 0)
    num_heads = 4
    local_window_size = window_size[0] * window_size[1]     # 16
    n_global = 4
    S = local_window_size + n_global                        # 20
    B = 4

    coords_np, rel_idx_np = build_buffers(window_size, pretrained_window_size)
    T = coords_np.shape[0]                                  # 49
    gpad = build_gather_pad_matrix(rel_idx_np, T, S, local_window_size)
    coords_table = jnp.asarray(coords_np)

    key = jax.random.PRNGKey(0)
    kx, k1, k2, k3 = jax.random.split(key, 4)
    x = jax.random.normal(kx, (B, num_heads, S, S), dtype=jnp.float32)
    w1 = jax.random.normal(k1, (HIDDEN, 2), dtype=jnp.float32) * 0.02   # Linear(2,512).weight
    b1 = jax.random.normal(k2, (HIDDEN,), dtype=jnp.float32) * 0.02     # Linear(2,512).bias
    w2 = jax.random.normal(k3, (num_heads, HIDDEN), dtype=jnp.float32) * 0.02  # Linear(512,H).weight

    ref = ref_forward(x, local_window_size, window_size, coords_table,
                      jnp.asarray(rel_idx_np), w1, b1, w2)

    # Full forward path (rebuilds bias, then adds) — matches non-deploy forward.
    out = jax.block_until_ready(
        pos_emb_mlp_swinv2d_forward(x, local_window_size, coords_table, gpad,
                                    w1, b1, w2))
    np.testing.assert_allclose(np.asarray(out), np.asarray(ref),
                               rtol=2e-3, atol=2e-3)

    # Cached / deploy-like steady state: bias built once (stored in x.dtype),
    # per-step cost is the broadcast add only.
    pos_emb = compute_pos_bias(coords_table, w1, b1, w2, gpad, S).astype(x.dtype)
    out_cached = jax.block_until_ready(
        pos_emb_mlp_swinv2d_forward(x, local_window_size, coords_table, gpad,
                                    w1, b1, w2, pos_emb=pos_emb))
    np.testing.assert_allclose(np.asarray(out_cached), np.asarray(ref),
                               rtol=2e-3, atol=2e-3)

    # In-place variant: the input buffer is dead after the add -> alias it.
    x_dead = x + 0.0                                        # fresh buffer
    out_inplace = jax.block_until_ready(
        add_pos_bias(x_dead, pos_emb, donate=True))
    np.testing.assert_allclose(np.asarray(out_inplace), np.asarray(ref),
                               rtol=2e-3, atol=2e-3)

    print("KERNEL_OK")
</pallas_src>

<mosaic_0001>
module attributes {stable_mosaic.version = 11 : i64} {
  func.func @_bias_table_kernel(%arg0: i32, %arg1: memref<2x49xf32, #tpu.memory_space<vmem>>, %arg2: memref<512x2xf32, #tpu.memory_space<vmem>>, %arg3: memref<512x1xf32, #tpu.memory_space<vmem>>, %arg4: memref<4x512xf32, #tpu.memory_space<vmem>>, %arg5: memref<49x512xf32, #tpu.memory_space<vmem>>, %arg6: memref<4x512xf32, #tpu.memory_space<vmem>>) attributes {dimension_semantics = [#tpu.dimension_semantics<parallel>], iteration_bounds = array<i64: 1>, scalar_prefetch = 0 : i64, scratch_operands = 0 : i64, tpu.core_type = #tpu.core_type<tc>, window_params = [{pipeline_mode = #tpu.pipeline_mode<synchronous>, transform_indices = @transform_0, window_bounds = array<i64: 2, 49>}, {pipeline_mode = #tpu.pipeline_mode<synchronous>, transform_indices = @transform_1, window_bounds = array<i64: 512, 2>}, {pipeline_mode = #tpu.pipeline_mode<synchronous>, transform_indices = @transform_2, window_bounds = array<i64: 512, 1>}, {pipeline_mode = #tpu.pipeline_mode<synchronous>, transform_indices = @transform_3, window_bounds = array<i64: 4, 512>}, {transform_indices = @transform_4, window_bounds = array<i64: 49, 512>}, {transform_indices = @transform_5, window_bounds = array<i64: 4, 512>}]} {
    %c0 = arith.constant 0 : index
    %c0_0 = arith.constant 0 : index
    %0 = vector.load %arg1[%c0, %c0_0] : memref<2x49xf32, #tpu.memory_space<vmem>>, vector<2x49xf32>
    %c0_1 = arith.constant 0 : index
    %c0_2 = arith.constant 0 : index
    %1 = vector.load %arg2[%c0_1, %c0_2] : memref<512x2xf32, #tpu.memory_space<vmem>>, vector<512x2xf32>
    %2 = vector.extract_strided_slice %1 {offsets = [0, 0], sizes = [512, 1], strides = [1, 1]} : vector<512x2xf32> to vector<512x1xf32>
    %3 = vector.extract_strided_slice %0 {offsets = [0, 0], sizes = [1, 49], strides = [1, 1]} : vector<2x49xf32> to vector<1x49xf32>
    %4 = vector.broadcast %2 : vector<512x1xf32> to vector<512x49xf32>
    %5 = vector.broadcast %3 : vector<1x49xf32> to vector<512x49xf32>
    %6 = arith.mulf %4, %5 : vector<512x49xf32>
    %7 = vector.extract_strided_slice %1 {offsets = [0, 1], sizes = [512, 1], strides = [1, 1]} : vector<512x2xf32> to vector<512x1xf32>
    %8 = vector.extract_strided_slice %0 {offsets = [1, 0], sizes = [1, 49], strides = [1, 1]} : vector<2x49xf32> to vector<1x49xf32>
    %9 = vector.broadcast %7 : vector<512x1xf32> to vector<512x49xf32>
    %10 = vector.broadcast %8 : vector<1x49xf32> to vector<512x49xf32>
    %11 = arith.mulf %9, %10 : vector<512x49xf32>
    %12 = arith.addf %6, %11 : vector<512x49xf32>
    %c0_3 = arith.constant 0 : index
    %c0_4 = arith.constant 0 : index
    %13 = vector.load %arg3[%c0_3, %c0_4] : memref<512x1xf32, #tpu.memory_space<vmem>>, vector<512x1xf32>
    %14 = vector.broadcast %13 : vector<512x1xf32> to vector<512x49xf32>
    %15 = arith.addf %12, %14 : vector<512x49xf32>
    %cst = arith.constant 0.000000e+00 : f32
    %16 = vector.broadcast %cst : f32 to vector<512x49xf32>
    %17 = arith.maximumf %15, %16 : vector<512x49xf32>
    %c0_5 = arith.constant 0 : index
    %c0_6 = arith.constant 0 : index
    %18 = vector.load %arg4[%c0_5, %c0_6] : memref<4x512xf32, #tpu.memory_space<vmem>>, vector<4x512xf32>
    %cst_7 = arith.constant dense<0.000000e+00> : vector<4x49xf32>
    %19 = tpu.matmul %18, %17, %cst_7 {dimension_numbers = #tpu.dot_dimension_numbers<[1], [0], [0], [1], [0, 0, 1, 1], [], []>} : vector<4x512xf32>, vector<512x49xf32>, vector<4x49xf32> -> vector<4x49xf32>
    %20 = arith.negf %19 : vector<4x49xf32>
    %21 = math.exp %20 : vector<4x49xf32>
    %cst_8 = arith.constant 1.000000e+00 : f32
    %22 = vector.broadcast %cst_8 : f32 to vector<4x49xf32>
    %23 = arith.addf %22, %21 : vector<4x49xf32>
    %24 = arith.divf %22, %23 : vector<4x49xf32>
    %cst_9 = arith.constant 1.600000e+01 : f32
    %25 = vector.broadcast %cst_9 : f32 to vector<4x49xf32>
    %26 = arith.mulf %25, %24 : vector<4x49xf32>
    %c0_10 = arith.constant 0 : index
    %c0_11 = arith.constant 0 : index
    %27 = vector.load %arg5[%c0_10, %c0_11] : memref<49x512xf32, #tpu.memory_space<vmem>>, vector<49x512xf32>
    %cst_12 = arith.constant dense<0.000000e+00> : vector<4x512xf32>
    %28 = tpu.matmul %26, %27, %cst_12 {dimension_numbers = #tpu.dot_dimension_numbers<[1], [0], [0], [1], [0, 0, 1, 1], [], []>} : vector<4x49xf32>, vector<49x512xf32>, vector<4x512xf32> -> vector<4x512xf32>
    %c0_13 = arith.constant 0 : index
    %c0_14 = arith.constant 0 : index
    %29 = vector.load %arg6[%c0_13, %c0_14] : memref<4x512xf32, #tpu.memory_space<vmem>>, vector<4x512xf32>
    tpu.vector_store %arg6[%c0_13, %c0_14], %28 {strides = array<i32>} : memref<4x512xf32, #tpu.memory_space<vmem>>, vector<4x512xf32>,
    return
  }
  func.func @transform_0(%arg0: i32) -> (i32, i32) {
    %c0_i32 = arith.constant 0 : i32
    %c0_i32_0 = arith.constant 0 : i32
    %c0_i32_1 = arith.constant 0 : i32
    return %c0_i32, %c0_i32_0 : i32, i32
  }
  func.func @transform_1(%arg0: i32) -> (i32, i32) {
    %c0_i32 = arith.constant 0 : i32
    %c0_i32_0 = arith.constant 0 : i32
    %c0_i32_1 = arith.constant 0 : i32
    return %c0_i32, %c0_i32_0 : i32, i32
  }
  func.func @transform_2(%arg0: i32) -> (i32, i32) {
    %c0_i32 = arith.constant 0 : i32
    %c0_i32_0 = arith.constant 0 : i32
    %c0_i32_1 = arith.constant 0 : i32
    return %c0_i32, %c0_i32_0 : i32, i32
  }
  func.func @transform_3(%arg0: i32) -> (i32, i32) {
    %c0_i32 = arith.constant 0 : i32
    %c0_i32_0 = arith.constant 0 : i32
    %c0_i32_1 = arith.constant 0 : i32
    return %c0_i32, %c0_i32_0 : i32, i32
  }
  func.func @transform_4(%arg0: i32) -> (i32, i32) {
    %c0_i32 = arith.constant 0 : i32
    %c0_i32_0 = arith.constant 0 : i32
    return %c0_i32, %arg0 : i32, i32
  }
  func.func @transform_5(%arg0: i32) -> (i32, i32) {
    %c0_i32 = arith.constant 0 : i32
    %c0_i32_0 = arith.constant 0 : i32
    return %c0_i32, %arg0 : i32, i32
  }
}

</mosaic_0001>

<bundles_post_ra>
// kernel: tpu_custom_call.1
= control target key start
LH: loop header
LB: loop body
LE: loop exit
PB: predicated region body
PF: predicated region fallthrough
CT: control target
= control target key end

     0   :  { %v1687_v2 = vmov 1   ;;  %v2737_v3 = vmov 0   ;;  %s2731_s0 = inlined_call_operand.vmem [shape: f32[2,49], index: 0, kind: input, shape index: {}]   ;;  %s2732_s1 = inlined_call_operand.vmem [shape: f32[512,2], index: 1, kind: input, shape index: {}]   ;;  %s2733_s2 = inlined_call_operand.vmem [shape: f32[512,1], index: 2, kind: input, shape index: {}]   ;;  %s2734_s3 = inlined_call_operand.vmem [shape: f32[4,512], index: 3, kind: input, shape index: {}]   ;;  %s2735_s4 = inlined_call_operand.vmem [shape: f32[49,512], index: 4, kind: input, shape index: {}]   ;;  %s2736_s5 = inlined_call_operand.hbm [shape: f32[4,512], index: 5, kind: output, shape index: {}]  }
   0x1   :  { %v1723_v0 = vld [vmem:[%s2732_s1 + $0x20] sm:$0xff]  ;;  %v24_v1 = vld [vmem:[%s2732_s1 + $0x10] sm:$0xff]  ;;  %1653 = vset.pattern.permute.xlu0 %v1687_v2  ;;  %1650 = vset.pattern.permute.xlu2 %v2737_v3 }
   0x2   :  { %1649 = vset.pattern.permute.xlu1 %v2737_v3  ;;  %108 = vperm.xlu2 %1650, %v1723_v0  }
   0x3   :  { %480 = vperm.xlu0 %1653, %v24_v1   ;;  %98 = vperm.xlu1 %1649, %v24_v1  }
   0x4   :  { %10 = vsyncpa [#allocation3], 0  ;;  %v1735_v4 = vld [vmem:[%s2732_s1 + $0x28] sm:$0xff]  ;;  %v29_v5 = vld [vmem:[%s2732_s1 + $0x38] sm:$0xff]  ;;  %vm1515_vm0 = vcmask 1040384   ;;  %vm1511_vm5 = vcmask 400384  }
   0x5   :  { %v1743_v6 = vld [vmem:[%s2732_s1 + $0x18] sm:$0xff]  ;;  %v1750_v7 = vld [vmem:[%s2732_s1 + $0x40] sm:$0xff]  ;;  %v32_v8 = vld [vmem:[%s2732_s1 + $0x50] sm:$0xff]  ;;  %vm1614_vm6 = vcmask 1043456   ;;  %s1628_s18 = sshll.u32 %s2736_s5, 4  ;;  %s1629_s18 = int_to_ptr.hbm [resolvable:$true] %s1628_s18 }
   0x6   :  { %v1759_v9 = vld [vmem:[%s2732_s1 + $0x58] sm:$0xff]  ;;  %v35_v10 = vld [vmem:[%s2732_s1 + $0x68] sm:$0xff]  ;;  %v1768_v11 = vld [vmem:[%s2732_s1 + $0x70] sm:$0xff] }
   0x7   :  { %v38_v12 = vld [vmem:[%s2732_s1 + $0x80] sm:$0xff]  ;;  %v1777_v13 = vld [vmem:[%s2732_s1 + $0x88] sm:$0xff]  ;;  %v41_v14 = vld [vmem:[%s2732_s1 + $0x98] sm:$0xff] }
   0x8   :  { %v1786_v15 = vld [vmem:[%s2732_s1 + $0xa0] sm:$0xff]  ;;  %v44_v16 = vld [vmem:[%s2732_s1 + $0xb0] sm:$0xff]  ;;  %v1795_v17 = vld [vmem:[%s2732_s1 + $0xb8] sm:$0xff] }
   0x9   :  { %v47_v18 = vld [vmem:[%s2732_s1 + $0xc8] sm:$0xff]  ;;  %v1804_v19 = vld [vmem:[%s2732_s1 + $0xd0] sm:$0xff]  ;;  %v50_v20 = vld [vmem:[%s2732_s1 + $0xe0] sm:$0xff] }
   0xa   :  { %113 = vperm.xlu2 %1650, %v1735_v4   ;;  %v1813_v21 = vld [vmem:[%s2732_s1 + $0xe8] sm:$0xff]  ;;  %v53_v22 = vld [vmem:[%s2732_s1 + $0xf8] sm:$0xff]  ;;  %v1822_v23 = vld [vmem:[%s2732_s1 + $0x100] sm:$0xff] }
   0xb   :  { %500 = vperm.xlu0 %1653, %v29_v5   ;;  %103 = vperm.xlu1 %1649, %v1743_v6   ;;  %v56_v24 = vld [vmem:[%s2732_s1 + $0x110] sm:$0xff]  ;;  %v1831_v25 = vld [vmem:[%s2732_s1 + $0x118] sm:$0xff]  ;;  %v59_v26 = vld [vmem:[%s2732_s1 + $0x128] sm:$0xff] }
   0xc   :  { %v1842_v28 = vld [vmem:[%s2732_s1 + $0x130] sm:$0xff]  ;;  %v62_v29 = vld [vmem:[%s2732_s1 + $0x140] sm:$0xff]  ;;  %v1853_v31 = vld [vmem:[%s2732_s1 + $0x148] sm:$0xff] }
   0xd   :  { %v65_v32 = vld [vmem:[%s2732_s1 + $0x158] sm:$0xff]  ;;  %v1864_v34 = vld [vmem:[%s2732_s1 + $0x160] sm:$0xff]  ;;  %v68_v35 = vld [vmem:[%s2732_s1 + $0x170] sm:$0xff] }
   0xe   :  { %v1879_v39 = vld [vmem:[%s2732_s1 + $0x178] sm:$0xff]  ;;  %v71_v40 = vld [vmem:[%s2732_s1 + $0x188] sm:$0xff]  ;;  %v1894_v44 = vld [vmem:[%s2732_s1 + $0x190] sm:$0xff] }
   0xf   :  { %v74_v45 = vld [vmem:[%s2732_s1 + $0x1a0] sm:$0xff]  ;;  %v1909_v49 = vld [vmem:[%s2732_s1 + $0x1a8] sm:$0xff]  ;;  %v77_v50 = vld [vmem:[%s2732_s1 + $0x1b8] sm:$0xff] }
  0x10   :  { %v1924_v54 = vld [vmem:[%s2732_s1 + $0x1c0] sm:$0xff]  ;;  %v80_v55 = vld [vmem:[%s2732_s1 + $0x1d0] sm:$0xff]  ;;  %v1939_v59 = vld [vmem:[%s2732_s1 + $0x1d8] sm:$0xff] }
  0x11   :  { %v83_v60 = vld [vmem:[%s2732_s1 + $0x1e8] sm:$0xff]  ;;  %v1954_v1 = vld [vmem:[%s2732_s1 + $0x1f0] sm:$0xff] }
  0x12   :  { %128 = vperm.xlu2 %1650, %v1750_v7  }
  0x13   :  { %512 = vperm.xlu0 %1653, %v32_v8   ;;  %123 = vperm.xlu1 %1649, %v29_v5   ;;  %v22_v5 = vld [vmem:[%s2732_s1] sm:$0xff] }
  0x1a   :  { %143 = vperm.xlu2 %1650, %v1759_v9  }
  0x1b   :  { %524 = vperm.xlu0 %1653, %v35_v10   ;;  %138 = vperm.xlu1 %1649, %v32_v8  }
  0x22   :  { %158 = vperm.xlu2 %1650, %v1768_v11  }
  0x23   :  { %536 = vperm.xlu0 %1653, %v38_v12   ;;  %153 = vperm.xlu1 %1649, %v35_v10  }
  0x2a   :  { %173 = vperm.xlu2 %1650, %v1777_v13  }
  0x2b   :  { %548 = vperm.xlu0 %1653, %v41_v14   ;;  %168 = vperm.xlu1 %1649, %v38_v12  }
  0x32   :  { %188 = vperm.xlu2 %1650, %v1786_v15  }
  0x33   :  { %560 = vperm.xlu0 %1653, %v44_v16   ;;  %183 = vperm.xlu1 %1649, %v41_v14   ;;  %v23_v14 = vld [vmem:[%s2732_s1 + $0x8] sm:$0xff] }
  0x3a   :  { %203 = vperm.xlu2 %1650, %v1795_v17  }
  0x3b   :  { %572 = vperm.xlu0 %1653, %v47_v18   ;;  %198 = vperm.xlu1 %1649, %v44_v16  }
  0x42   :  { %218 = vperm.xlu2 %1650, %v1804_v19  }
  0x43   :  { %584 = vperm.xlu0 %1653, %v50_v20   ;;  %213 = vperm.xlu1 %1649, %v47_v18  }
  0x4a   :  { %233 = vperm.xlu2 %1650, %v1813_v21  }
  0x4b   :  { %596 = vperm.xlu0 %1653, %v53_v22   ;;  %228 = vperm.xlu1 %1649, %v50_v20  }
  0x52   :  { %248 = vperm.xlu2 %1650, %v1822_v23  }
  0x53   :  { %608 = vperm.xlu0 %1653, %v56_v24   ;;  %243 = vperm.xlu1 %1649, %v53_v22   ;;  %v28_v22 = vld [vmem:[%s2732_s1 + $0x30] sm:$0xff] }
  0x5a   :  { %263 = vperm.xlu2 %1650, %v1831_v25  }
  0x5b   :  { %620 = vperm.xlu0 %1653, %v59_v26   ;;  %258 = vperm.xlu1 %1649, %v56_v24  }
  0x5c   :  { %v1837_v27 = vpop.permute.xlu2 %108 }
  0x5d   :  { %2739 = vst [vmem:[#allocation5_spill] sm:$0xff] %v1837_v27 }
  0x62   :  { %278 = vperm.xlu2 %1650, %v1842_v28  }
  0x63   :  { %632 = vperm.xlu0 %1653, %v62_v29   ;;  %273 = vperm.xlu1 %1649, %v59_v26  }
  0x64   :  { %v1848_v30 = vpop.permute.xlu2 %113 }
  0x65   :  { %2740 = vst [vmem:[#allocation6_spill] sm:$0xff] %v1848_v30 }
  0x6a   :  { %293 = vperm.xlu2 %1650, %v1853_v31  }
  0x6b   :  { %644 = vperm.xlu0 %1653, %v65_v32   ;;  %288 = vperm.xlu1 %1649, %v62_v29   ;;  %v31_v29 = vld [vmem:[%s2732_s1 + $0x48] sm:$0xff] }
  0x6c   :  { %v1859_v33 = vpop.permute.xlu2 %128 }
  0x6d   :  { %2741 = vst [vmem:[#allocation7_spill] sm:$0xff] %v1859_v33 }
  0x72   :  { %308 = vperm.xlu2 %1650, %v1864_v34  }
  0x73   :  { %656 = vperm.xlu0 %1653, %v68_v35   ;;  %303 = vperm.xlu1 %1649, %v65_v32  }
  0x74   :  { %v1870_v36 = vpop.permute.xlu2 %143 }
  0x75   :  { %v1872_v37 = vpop.permute.xlu0 %480  ;;  %v1874_v38 = vpop.permute.xlu1 %98 }
  0x76   :  { %2742 = vst [vmem:[#allocation8_spill] sm:$0xff] %v1872_v37 }
  0x77   :  { %2743 = vst [vmem:[#allocation9_spill] sm:$0xff] %v1874_v38 }
  0x7a   :  { %323 = vperm.xlu2 %1650, %v1879_v39  }
  0x7b   :  { %668 = vperm.xlu0 %1653, %v71_v40   ;;  %318 = vperm.xlu1 %1649, %v68_v35  }
  0x7c   :  { %v1885_v41 = vpop.permute.xlu2 %158 }
  0x7d   :  { %v1887_v42 = vpop.permute.xlu0 %500  ;;  %v1889_v43 = vpop.permute.xlu1 %103 }
  0x7e   :  { %2744 = vst [vmem:[#allocation10_spill] sm:$0xff] %v1887_v42 }
  0x7f   :  { %2745 = vst [vmem:[#allocation11_spill] sm:$0xff] %v1889_v43 }
  0x82   :  { %338 = vperm.xlu2 %1650, %v1894_v44  }
  0x83   :  { %680 = vperm.xlu0 %1653, %v74_v45   ;;  %333 = vperm.xlu1 %1649, %v71_v40  }
  0x84   :  { %v1900_v46 = vpop.permute.xlu2 %173 }
  0x85   :  { %2746 = vst [vmem:[#allocation12_spill] sm:$0xff] %v1900_v46  ;;  %v1902_v47 = vpop.permute.xlu0 %512  ;;  %v1904_v48 = vpop.permute.xlu1 %123  ;;  %v52_v46 = vld [vmem:[%s2732_s1 + $0xf0] sm:$0xff] }
  0x86   :  { %2747 = vst [vmem:[#allocation13_spill] sm:$0xff] %v1904_v48 }
  0x8a   :  { %353 = vperm.xlu2 %1650, %v1909_v49  }
  0x8b   :  { %692 = vperm.xlu0 %1653, %v77_v50   ;;  %348 = vperm.xlu1 %1649, %v74_v45  }
  0x8c   :  { %v1915_v51 = vpop.permute.xlu2 %188 }
  0x8d   :  { %2748 = vst [vmem:[#allocation14_spill] sm:$0xff] %v1915_v51  ;;  %v1917_v52 = vpop.permute.xlu0 %524  ;;  %v1919_v53 = vpop.permute.xlu1 %138 }
  0x92   :  { %368 = vperm.xlu2 %1650, %v1924_v54  }
  0x93   :  { %704 = vperm.xlu0 %1653, %v80_v55   ;;  %363 = vperm.xlu1 %1649, %v77_v50  }
  0x94   :  { %v1930_v56 = vpop.permute.xlu2 %203 }
  0x95   :  { %2749 = vst [vmem:[#allocation15_spill] sm:$0xff] %v1930_v56  ;;  %v1932_v57 = vpop.permute.xlu0 %536  ;;  %v1934_v58 = vpop.permute.xlu1 %153 }
  0x96   :  { %2750 = vst [vmem:[#allocation16_spill] sm:$0xff] %v1932_v57 }
  0x9a   :  { %383 = vperm.xlu2 %1650, %v1939_v59  }
  0x9b   :  { %716 = vperm.xlu0 %1653, %v83_v60   ;;  %378 = vperm.xlu1 %1649, %v80_v55  }
  0x9c   :  { %v1945_v61 = vpop.permute.xlu2 %218 }
  0x9d   :  { %v1947_v62 = vpop.permute.xlu0 %548  ;;  %v1949_v63 = vpop.permute.xlu1 %168 }
  0x9e   :  { %2751 = vst [vmem:[#allocation17_spill] sm:$0xff] %v1947_v62 }
  0x9f   :  { %2752 = vst [vmem:[#allocation18_spill] sm:$0xff] %v1949_v63 }
  0xa2   :  { %398 = vperm.xlu2 %1650, %v1954_v1  }
  0xa3   :  { %1654 = vset.pattern.permute.xlu0 %v2737_v3  ;;  %393 = vperm.xlu1 %1649, %v83_v60  }
  0xa4   :  { %88 = vperm.xlu0 %1654, %v22_v5   ;;  %v1961_v8 = vpop.permute.xlu2 %233 }
  0xa5   :  { %v1963_v10 = vpop.permute.xlu0 %560  ;;  %v1965_v12 = vpop.permute.xlu1 %183 }
  0xa6   :  { %2753 = vst [vmem:[#allocation19_spill] sm:$0xff] %v1963_v10 }
  0xa7   :  { %2754 = vst [vmem:[#allocation20_spill] sm:$0xff] %v1965_v12 }
  0xaa   :  { %1652 = vset.pattern.permute.xlu2 %v1687_v2 }
  0xab   :  { %1651 = vset.pattern.permute.xlu1 %v1687_v2  ;;  %476 = vperm.xlu2 %1652, %v23_v14  }
  0xac   :  { %93 = vperm.xlu0 %1654, %v23_v14   ;;  %472 = vperm.xlu1 %1651, %v22_v5   ;;  %v1972_v16 = vpop.permute.xlu2 %248 }
  0xad   :  { %2755 = vst [vmem:[#allocation21_spill] sm:$0xff] %v1972_v16  ;;  %v1974_v18 = vpop.permute.xlu0 %572  ;;  %v1976_v20 = vpop.permute.xlu1 %198 }
  0xae   :  { %2756 = vst [vmem:[#allocation22_spill] sm:$0xff] %v1974_v18 }
  0xaf   :  { %2757 = vst [vmem:[#allocation23_spill] sm:$0xff] %v1976_v20 }
  0xb3   :  { %488 = vperm.xlu2 %1652, %v1723_v0  }
  0xb4   :  { %118 = vperm.xlu0 %1654, %v28_v22   ;;  %484 = vperm.xlu1 %1651, %v1743_v6   ;;  %v1983_v24 = vpop.permute.xlu2 %263  ;;  %v34_v6 = vld [vmem:[%s2732_s1 + $0x60] sm:$0xff] }
  0xb5   :  { %2758 = vst [vmem:[#allocation24_spill] sm:$0xff] %v1983_v24  ;;  %v1985_v2 = vpop.permute.xlu0 %584  ;;  %v1987_v26 = vpop.permute.xlu1 %213 }
  0xbb   :  { %496 = vperm.xlu2 %1652, %v28_v22  }
  0xbc   :  { %133 = vperm.xlu0 %1654, %v31_v29   ;;  %492 = vperm.xlu1 %1651, %v1735_v4   ;;  %v1993_v32 = vpop.permute.xlu2 %278  ;;  %v37_v4 = vld [vmem:[%s2732_s1 + $0x78] sm:$0xff] }
  0xbd   :  { %2759 = vst [vmem:[#allocation25_spill] sm:$0xff] %v1993_v32  ;;  %v1995_v0 = vpop.permute.xlu0 %596  ;;  %v1997_v35 = vpop.permute.xlu1 %228 }
  0xc3   :  { %508 = vperm.xlu2 %1652, %v31_v29  }
  0xc4   :  { %148 = vperm.xlu0 %1654, %v34_v6   ;;  %504 = vperm.xlu1 %1651, %v1750_v7   ;;  %v2003_v40 = vpop.permute.xlu2 %293  ;;  %v40_v7 = vld [vmem:[%s2732_s1 + $0x90] sm:$0xff] }
  0xc5   :  { %v2005_v45 = vpop.permute.xlu0 %608  ;;  %v2007_v50 = vpop.permute.xlu1 %243 }
  0xc6   :  { %2760 = vst [vmem:[#allocation26_spill] sm:$0xff] %v2005_v45 }
  0xcb   :  { %520 = vperm.xlu2 %1652, %v34_v6  }
  0xcc   :  { %163 = vperm.xlu0 %1654, %v37_v4   ;;  %516 = vperm.xlu1 %1651, %v1759_v9   ;;  %v2013_v55 = vpop.permute.xlu2 %308  ;;  %v43_v9 = vld [vmem:[%s2732_s1 + $0xa8] sm:$0xff] }
  0xcd   :  { %v2015_v60 = vpop.permute.xlu0 %620  ;;  %v2017_v5 = vpop.permute.xlu1 %258 }
  0xce   :  { %2761 = vst [vmem:[#allocation27_spill] sm:$0xff] %v2015_v60 }
  0xcf   :  { %2762 = vst [vmem:[#allocation28_spill] sm:$0xff] %v2017_v5 }
  0xd3   :  { %532 = vperm.xlu2 %1652, %v37_v4  }
  0xd4   :  { %178 = vperm.xlu0 %1654, %v40_v7   ;;  %528 = vperm.xlu1 %1651, %v1768_v11   ;;  %v2023_v14 = vpop.permute.xlu2 %323  ;;  %v46_v11 = vld [vmem:[%s2732_s1 + $0xc0] sm:$0xff] }
  0xd5   :  { %v2025_v22 = vpop.permute.xlu0 %632  ;;  %v2027_v29 = vpop.permute.xlu1 %273 }
  0xd6   :  { %2763 = vst [vmem:[#allocation29_spill] sm:$0xff] %v2027_v29 }
  0xdb   :  { %544 = vperm.xlu2 %1652, %v40_v7  }
  0xdc   :  { %193 = vperm.xlu0 %1654, %v43_v9   ;;  %540 = vperm.xlu1 %1651, %v1777_v13   ;;  %v2033_v6 = vpop.permute.xlu2 %338  ;;  %v49_v13 = vld [vmem:[%s2732_s1 + $0xd8] sm:$0xff] }
  0xdd   :  { %v2035_v4 = vpop.permute.xlu0 %644  ;;  %v2037_v3 = vpop.permute.xlu1 %288 }
  0xe3   :  { %556 = vperm.xlu2 %1652, %v43_v9  }
  0xe4   :  { %208 = vperm.xlu0 %1654, %v46_v11   ;;  %552 = vperm.xlu1 %1651, %v1786_v15   ;;  %v2043_v57 = vpop.permute.xlu2 %353  ;;  %v21_v15 = vld [vmem:[%s2731_s0] sm:$0x3] }
  0xe5   :  { %v2045_v7 = vpop.permute.xlu0 %656  ;;  %v2047_v63 = vpop.permute.xlu1 %303  ;;  %v2063_v62 = vperm.slane %v21_v15, 0 }
  0xeb   :  { %568 = vperm.xlu2 %1652, %v46_v11   ;;  %v2065_v11 = vperm.slane %v21_v15, 1 }
  0xec   :  { %223 = vperm.xlu0 %1654, %v49_v13   ;;  %564 = vperm.xlu1 %1651, %v1795_v17   ;;  %v2053_v38 = vpop.permute.xlu2 %368 }
  0xed   :  { %v669_v9 = vpop.permute.xlu0 %668  ;;  %v2055_v37 = vpop.permute.xlu1 %318 }
  0xee   :  { %v777_v45 = vmul.f32 %v2065_v11, %v669_v9 }
  0xf3   :  { %580 = vperm.xlu2 %1652, %v49_v13   ;;  %v55_v13 = vld [vmem:[%s2732_s1 + $0x108] sm:$0xff] }
  0xf4   :  { %238 = vperm.xlu0 %1654, %v52_v46   ;;  %576 = vperm.xlu1 %1651, %v1804_v19   ;;  %v2068_v17 = vpop.permute.xlu2 %383 }
  0xf5   :  { %v681_v16 = vpop.permute.xlu0 %680  ;;  %v334_v12 = vpop.permute.xlu1 %333 }
  0xf6   :  { %v456_v5 = vmul.f32 %v2063_v62, %v334_v12  ;;  %v780_v27 = vmul.f32 %v2065_v11, %v681_v16  ;;  %v58_v12 = vld [vmem:[%s2732_s1 + $0x120] sm:$0xff] }
  0xf8   :  { %v2072_v43 = vadd.f32 %v777_v45, %v456_v5 }
  0xfa   :  { %2764 = vst [vmem:[#allocation30_spill] sm:$0xff] %v2072_v43 }
  0xfb   :  { %592 = vperm.xlu2 %1652, %v52_v46  }
  0xfc   :  { %253 = vperm.xlu0 %1654, %v55_v13   ;;  %588 = vperm.xlu1 %1651, %v1813_v21   ;;  %v2078_v15 = vpop.permute.xlu2 %398 }
  0xfd   :  { %v693_v19 = vpop.permute.xlu0 %692  ;;  %v349_v30 = vpop.permute.xlu1 %348 }
  0xfe   :  { %v459_v9 = vmul.f32 %v2063_v62, %v349_v30  ;;  %v783_v45 = vmul.f32 %v2065_v11, %v693_v19 }
 0x100   :  { %v2082_v51 = vadd.f32 %v780_v27, %v459_v9  ;;  %v61_v27 = vld [vmem:[%s2732_s1 + $0x138] sm:$0xff] }
 0x102   :  { %2765 = vst [vmem:[#allocation31_spill] sm:$0xff] %v2082_v51 }
 0x103   :  { %604 = vperm.xlu2 %1652, %v55_v13  }
 0x104   :  { %268 = vperm.xlu0 %1654, %v58_v12   ;;  %600 = vperm.xlu1 %1651, %v1822_v23  }
 0x105   :  { %v705_v46 = vpop.permute.xlu0 %704  ;;  %v364_v21 = vpop.permute.xlu1 %363 }
 0x106   :  { %v462_v5 = vmul.f32 %v2063_v62, %v364_v21  ;;  %v477_v43 = vpop.permute.xlu2 %476  ;;  %v786_v23 = vmul.f32 %v2065_v11, %v705_v46 }
 0x108   :  { %v2090_v16 = vadd.f32 %v783_v45, %v462_v5  ;;  %v64_v45 = vld [vmem:[%s2732_s1 + $0x150] sm:$0xff] }
 0x10a   :  { %2766 = vst [vmem:[#allocation32_spill] sm:$0xff] %v2090_v16 }
 0x10b   :  { %616 = vperm.xlu2 %1652, %v58_v12  }
 0x10c   :  { %283 = vperm.xlu0 %1654, %v61_v27   ;;  %612 = vperm.xlu1 %1651, %v1831_v25  }
 0x10d   :  { %v717_v30 = vpop.permute.xlu0 %716  ;;  %v379_v13 = vpop.permute.xlu1 %378 }
 0x10e   :  { %v465_v9 = vmul.f32 %v2063_v62, %v379_v13  ;;  %v2098_v19 = vpop.permute.xlu2 %488  ;;  %v789_v25 = vmul.f32 %v2065_v11, %v717_v30 }
 0x10f   :  { %2767 = vst [vmem:[#allocation33_spill] sm:$0xff] %v2098_v19 }
 0x110   :  { %v2100_v21 = vadd.f32 %v786_v23, %v465_v9  ;;  %v67_v23 = vld [vmem:[%s2732_s1 + $0x168] sm:$0xff] }
 0x113   :  { %628 = vperm.xlu2 %1652, %v61_v27   ;;  %v729_v27 = vmul.f32 %v2065_v11, %v477_v43 }
 0x114   :  { %298 = vperm.xlu0 %1654, %v64_v45   ;;  %624 = vperm.xlu1 %1651, %v1842_v28  }
 0x115   :  { %v394_v12 = vpop.permute.xlu1 %393 }
 0x116   :  { %v468_v5 = vmul.f32 %v2063_v62, %v394_v12  ;;  %v497_v46 = vpop.permute.xlu2 %496  ;;  %v89_v51 = vpop.permute.xlu0 %88 }
 0x117   :  { %v407_v28 = vmul.f32 %v2063_v62, %v89_v51  ;;  %v734_v51 = vmul.f32 %v2065_v11, %v497_v46 }
 0x118   :  { %v2108_v13 = vadd.f32 %v789_v25, %v468_v5  ;;  %v70_v5 = vld [vmem:[%s2732_s1 + $0x180] sm:$0xff] }
 0x11b   :  { %640 = vperm.xlu2 %1652, %v64_v45  }
 0x11c   :  { %313 = vperm.xlu0 %1654, %v67_v23   ;;  %636 = vperm.xlu1 %1651, %v1853_v31  }
 0x11e   :  { %v509_v9 = vpop.permute.xlu2 %508  ;;  %v94_v30 = vpop.permute.xlu0 %93 }
 0x11f   :  { %v408_v12 = vmul.f32 %v2063_v62, %v94_v30  ;;  %v473_v19 = vpop.permute.xlu1 %472 }
 0x120   :  { %v728_v25 = vmul.f32 %v2065_v11, %v473_v19  ;;  %v73_v19 = vld [vmem:[%s2732_s1 + $0x198] sm:$0xff] }
 0x121   :  { %v2121_v10 = vadd.f32 %v729_v27, %v408_v12 }
 0x122   :  { %v2123_v45 = vadd.f32 %v728_v25, %v407_v28  ;;  %v737_v28 = vmul.f32 %v2065_v11, %v509_v9  ;;  %v76_v25 = vld [vmem:[%s2732_s1 + $0x1b0] sm:$0xff] }
 0x123   :  { %652 = vperm.xlu2 %1652, %v67_v23  }
 0x124   :  { %328 = vperm.xlu0 %1654, %v70_v5   ;;  %648 = vperm.xlu1 %1651, %v1864_v34  }
 0x126   :  { %v521_v31 = vpop.permute.xlu2 %520  ;;  %v119_v43 = vpop.permute.xlu0 %118 }
 0x127   :  { %v413_v30 = vmul.f32 %v2063_v62, %v119_v43  ;;  %v2128_v24 = vpop.permute.xlu1 %484 }
 0x128   :  { %2768 = vst [vmem:[#allocation34_spill] sm:$0xff] %v2128_v24 }
 0x129   :  { %v2133_v27 = vadd.f32 %v734_v51, %v413_v30  ;;  %v740_v51 = vmul.f32 %v2065_v11, %v521_v31 }
 0x12b   :  { %2769 = vst [vmem:[#allocation35_spill] sm:$0xff] %v2133_v27  ;;  %664 = vperm.xlu2 %1652, %v70_v5  }
 0x12c   :  { %343 = vperm.xlu0 %1654, %v73_v19   ;;  %660 = vperm.xlu1 %1651, %v1879_v39  }
 0x12e   :  { %v533_v23 = vpop.permute.xlu2 %532  ;;  %v134_v34 = vpop.permute.xlu0 %133 }
 0x12f   :  { %v416_v46 = vmul.f32 %v2063_v62, %v134_v34  ;;  %v2138_v12 = vpop.permute.xlu1 %492  ;;  %v79_v34 = vld [vmem:[%s2732_s1 + $0x1c8] sm:$0xff] }
 0x130   :  { %2770 = vst [vmem:[#allocation36_spill] sm:$0xff] %v2138_v12 }
 0x131   :  { %v2143_v43 = vadd.f32 %v737_v28, %v416_v46  ;;  %v743_v28 = vmul.f32 %v2065_v11, %v533_v23 }
 0x133   :  { %676 = vperm.xlu2 %1652, %v73_v19  }
 0x134   :  { %358 = vperm.xlu0 %1654, %v76_v25   ;;  %672 = vperm.xlu1 %1651, %v1894_v44  }
 0x136   :  { %v545_v5 = vpop.permute.xlu2 %544  ;;  %v149_v39 = vpop.permute.xlu0 %148 }
 0x137   :  { %v419_v9 = vmul.f32 %v2063_v62, %v149_v39  ;;  %v2148_v30 = vpop.permute.xlu1 %504  ;;  %v82_v39 = vld [vmem:[%s2732_s1 + $0x1e0] sm:$0xff] }
 0x138   :  { %2771 = vst [vmem:[#allocation37_spill] sm:$0xff] %v2148_v30 }
 0x139   :  { %v2153_v24 = vadd.f32 %v740_v51, %v419_v9  ;;  %v746_v51 = vmul.f32 %v2065_v11, %v545_v5 }
 0x13b   :  { %688 = vperm.xlu2 %1652, %v76_v25  }
 0x13c   :  { %373 = vperm.xlu0 %1654, %v79_v34   ;;  %684 = vperm.xlu1 %1651, %v1909_v49  }
 0x13e   :  { %v557_v19 = vpop.permute.xlu2 %556  ;;  %v164_v44 = vpop.permute.xlu0 %163 }
 0x13f   :  { %v422_v31 = vmul.f32 %v2063_v62, %v164_v44  ;;  %v2158_v46 = vpop.permute.xlu1 %516  ;;  %v85_v44 = vld [vmem:[%s2732_s1 + $0x1f8] sm:$0xff] }
 0x141   :  { %v2163_v12 = vadd.f32 %v743_v28, %v422_v31  ;;  %v749_v28 = vmul.f32 %v2065_v11, %v557_v19 }
 0x143   :  { %700 = vperm.xlu2 %1652, %v79_v34  }
 0x144   :  { %388 = vperm.xlu0 %1654, %v82_v39   ;;  %696 = vperm.xlu1 %1651, %v1924_v54  }
 0x146   :  { %v569_v25 = vpop.permute.xlu2 %568  ;;  %v179_v49 = vpop.permute.xlu0 %178 }
 0x147   :  { %v425_v23 = vmul.f32 %v2063_v62, %v179_v49  ;;  %v2168_v9 = vpop.permute.xlu1 %528  ;;  %v856_v49 = vld [vmem:[%s2733_s2] sm:$0xff] }
 0x149   :  { %v2173_v20 = vadd.f32 %v746_v51, %v425_v23  ;;  %v752_v51 = vmul.f32 %v2065_v11, %v569_v25 }
 0x14b   :  { %2772 = vst [vmem:[#allocation38_spill] sm:$0xff] %v2173_v20  ;;  %712 = vperm.xlu2 %1652, %v82_v39  }
 0x14c   :  { %403 = vperm.xlu0 %1654, %v85_v44   ;;  %708 = vperm.xlu1 %1651, %v1939_v59  }
 0x14e   :  { %v581_v34 = vpop.permute.xlu2 %580  ;;  %v194_v54 = vpop.permute.xlu0 %193 }
 0x14f   :  { %v428_v5 = vmul.f32 %v2063_v62, %v194_v54  ;;  %v2178_v31 = vpop.permute.xlu1 %540  ;;  %v871_v54 = vld [vmem:[%s2733_s2 + $0x78] sm:$0xff] }
 0x150   :  { %2773 = vst [vmem:[#allocation39_spill] sm:$0xff] %v2178_v31 }
 0x151   :  { %v2183_v60 = vadd.f32 %v749_v28, %v428_v5  ;;  %v2777_v28 = vmov 0  }
 0x153   :  { %2774 = vst [vmem:[#allocation40_spill] sm:$0xff] %v2183_v60  ;;  %724 = vperm.xlu2 %1652, %v85_v44   ;;  %v903_v44 = vld [vmem:[%s2733_s2 + $0x178] sm:$0xff] }
 0x154   :  { %922 = vperm.xlu0 %1654, %v856_v49   ;;  %720 = vperm.xlu1 %1651, %v1954_v1   ;;  %v857_v1 = vld [vmem:[%s2733_s2 + $0x8] sm:$0xff]  ;;  %v755_v49 = vmul.f32 %v2065_v11, %v581_v34 }
 0x156   :  { %v593_v39 = vpop.permute.xlu2 %592  ;;  %v209_v59 = vpop.permute.xlu0 %208 }
 0x157   :  { %v431_v19 = vmul.f32 %v2063_v62, %v209_v59  ;;  %v2188_v23 = vpop.permute.xlu1 %552 }
 0x158   :  { %2775 = vst [vmem:[#allocation41_spill] sm:$0xff] %v2188_v23 }
 0x159   :  { %v2193_v20 = vadd.f32 %v752_v51, %v431_v19  ;;  %v918_v19 = vld [vmem:[%s2733_s2 + $0x1f0] sm:$0xff] }
 0x15b   :  { %2776 = vst [vmem:[#allocation42_spill] sm:$0xff] %v2193_v20  ;;  %1656 = vset.pattern.permute.xlu2 %v2777_v28  ;;  %v894_v20 = vld [vmem:[%s2733_s2 + $0x130] sm:$0xff] }
 0x15c   :  { %997 = vperm.xlu0 %1654, %v871_v54   ;;  %1655 = vset.pattern.permute.xlu1 %v2777_v28  ;;  %v919_v54 = vld [vmem:[%s2733_s2 + $0x1f8] sm:$0xff]  ;;  %v758_v28 = vmul.f32 %v2065_v11, %v593_v39 }
 0x15d   :  { %1157 = vperm.xlu2 %1656, %v903_v44   ;;  %927 = vperm.xlu1 %1655, %v857_v1   ;;  %v902_v44 = vld [vmem:[%s2733_s2 + $0x170] sm:$0xff] }
 0x15e   :  { %v605_v25 = vpop.permute.xlu2 %604  ;;  %v224_v5 = vpop.permute.xlu0 %223 }
 0x15f   :  { %v434_v59 = vmul.f32 %v2063_v62, %v224_v5  ;;  %v2205_v51 = vpop.permute.xlu1 %564 }
 0x160   :  { %2778 = vst [vmem:[#allocation43_spill] sm:$0xff] %v2205_v51 }
 0x161   :  { %v2210_v31 = vadd.f32 %v755_v49, %v434_v59  ;;  %v900_v49 = vld [vmem:[%s2733_s2 + $0x160] sm:$0xff] }
 0x164   :  { %1232 = vperm.xlu0 %1654, %v918_v19   ;;  %v901_v19 = vld [vmem:[%s2733_s2 + $0x168] sm:$0xff] }
 0x165   :  { %1237 = vperm.xlu2 %1656, %v919_v54   ;;  %1152 = vperm.xlu1 %1655, %v902_v44   ;;  %v887_v54 = vld [vmem:[%s2733_s2 + $0xf8] sm:$0xff] }
 0x166   :  { %v617_v34 = vpop.permute.xlu2 %616  ;;  %v239_v1 = vpop.permute.xlu0 %238 }
 0x167   :  { %v437_v5 = vmul.f32 %v2063_v62, %v239_v1  ;;  %v2220_v23 = vpop.permute.xlu1 %576  ;;  %v761_v1 = vmul.f32 %v2065_v11, %v605_v25 }
 0x169   :  { %v2225_v59 = vadd.f32 %v758_v28, %v437_v5  ;;  %v885_v28 = vld [vmem:[%s2733_s2 + $0xe8] sm:$0xff] }
 0x16c   :  { %1142 = vperm.xlu0 %1654, %v900_v49   ;;  %v886_v49 = vld [vmem:[%s2733_s2 + $0xf0] sm:$0xff] }
 0x16d   :  { %1147 = vperm.xlu2 %1656, %v901_v19   ;;  %1077 = vperm.xlu1 %1655, %v887_v54   ;;  %v870_v19 = vld [vmem:[%s2733_s2 + $0x70] sm:$0xff] }
 0x16e   :  { %v629_v39 = vpop.permute.xlu2 %628  ;;  %v254_v44 = vpop.permute.xlu0 %253 }
 0x16f   :  { %v440_v60 = vmul.f32 %v2063_v62, %v254_v44  ;;  %v2235_v29 = vpop.permute.xlu1 %588  ;;  %v764_v44 = vmul.f32 %v2065_v11, %v617_v34 }
 0x171   :  { %v2240_v5 = vadd.f32 %v761_v1, %v440_v60  ;;  %v868_v60 = vld [vmem:[%s2733_s2 + $0x60] sm:$0xff] }
 0x173   :  { %2779 = vst [vmem:[#allocation44_spill] sm:$0xff] %v2240_v5 }
 0x174   :  { %1067 = vperm.xlu0 %1654, %v885_v28   ;;  %v869_v28 = vld [vmem:[%s2733_s2 + $0x68] sm:$0xff] }
 0x175   :  { %1072 = vperm.xlu2 %1656, %v886_v49   ;;  %992 = vperm.xlu1 %1655, %v870_v19   ;;  %v917_v49 = vld [vmem:[%s2733_s2 + $0x1e8] sm:$0xff] }
 0x176   :  { %v641_v25 = vpop.permute.xlu2 %640  ;;  %v269_v54 = vpop.permute.xlu0 %268 }
 0x177   :  { %v443_v16 = vmul.f32 %v2063_v62, %v269_v54  ;;  %v2250_v27 = vpop.permute.xlu1 %600  ;;  %v767_v54 = vmul.f32 %v2065_v11, %v629_v39 }
 0x178   :  { %2780 = vst [vmem:[#allocation45_spill] sm:$0xff] %v2250_v27 }
 0x179   :  { %v2255_v1 = vadd.f32 %v764_v44, %v443_v16  ;;  %v915_v16 = vld [vmem:[%s2733_s2 + $0x1d8] sm:$0xff] }
 0x17b   :  { %2781 = vst [vmem:[#allocation46_spill] sm:$0xff] %v2255_v1 }
 0x17c   :  { %982 = vperm.xlu0 %1654, %v868_v60   ;;  %v916_v60 = vld [vmem:[%s2733_s2 + $0x1e0] sm:$0xff] }
 0x17d   :  { %987 = vperm.xlu2 %1656, %v869_v28   ;;  %1227 = vperm.xlu1 %1655, %v917_v49   ;;  %v899_v28 = vld [vmem:[%s2733_s2 + $0x158] sm:$0xff] }
 0x17e   :  { %v653_v34 = vpop.permute.xlu2 %652  ;;  %v284_v19 = vpop.permute.xlu0 %283 }
 0x17f   :  { %v446_v27 = vmul.f32 %v2063_v62, %v284_v19  ;;  %v2265_v5 = vpop.permute.xlu1 %612  ;;  %v770_v19 = vmul.f32 %v2065_v11, %v641_v25 }
 0x180   :  { %2782 = vst [vmem:[#allocation47_spill] sm:$0xff] %v2265_v5 }
 0x181   :  { %v2270_v44 = vadd.f32 %v767_v54, %v446_v27  ;;  %v897_v27 = vld [vmem:[%s2733_s2 + $0x148] sm:$0xff] }
 0x184   :  { %1217 = vperm.xlu0 %1654, %v915_v16   ;;  %v898_v16 = vld [vmem:[%s2733_s2 + $0x150] sm:$0xff] }
 0x185   :  { %1222 = vperm.xlu2 %1656, %v916_v60   ;;  %1137 = vperm.xlu1 %1655, %v899_v28   ;;  %v884_v60 = vld [vmem:[%s2733_s2 + $0xe0] sm:$0xff] }
 0x186   :  { %v665_v39 = vpop.permute.xlu2 %664  ;;  %v299_v49 = vpop.permute.xlu0 %298 }
 0x187   :  { %v449_v5 = vmul.f32 %v2063_v62, %v299_v49  ;;  %v2280_v1 = vpop.permute.xlu1 %624  ;;  %v773_v49 = vmul.f32 %v2065_v11, %v653_v34 }
 0x189   :  { %v2285_v54 = vadd.f32 %v770_v19, %v449_v5  ;;  %v882_v5 = vld [vmem:[%s2733_s2 + $0xd0] sm:$0xff] }
 0x18c   :  { %1127 = vperm.xlu0 %1654, %v897_v27   ;;  %v883_v27 = vld [vmem:[%s2733_s2 + $0xd8] sm:$0xff] }
 0x18d   :  { %1132 = vperm.xlu2 %1656, %v898_v16   ;;  %1062 = vperm.xlu1 %1655, %v884_v60   ;;  %v867_v16 = vld [vmem:[%s2733_s2 + $0x58] sm:$0xff] }
 0x18e   :  { %v677_v25 = vpop.permute.xlu2 %676  ;;  %v314_v28 = vpop.permute.xlu0 %313 }
 0x18f   :  { %v452_v33 = vmul.f32 %v2063_v62, %v314_v28  ;;  %v2295_v56 = vpop.permute.xlu1 %636  ;;  %v776_v28 = vmul.f32 %v2065_v11, %v665_v39 }
 0x191   :  { %v2300_v19 = vadd.f32 %v773_v49, %v452_v33  ;;  %v865_v33 = vld [vmem:[%s2733_s2 + $0x48] sm:$0xff] }
 0x194   :  { %1052 = vperm.xlu0 %1654, %v882_v5   ;;  %v866_v5 = vld [vmem:[%s2733_s2 + $0x50] sm:$0xff] }
 0x195   :  { %1057 = vperm.xlu2 %1656, %v883_v27   ;;  %977 = vperm.xlu1 %1655, %v867_v16   ;;  %v914_v27 = vld [vmem:[%s2733_s2 + $0x1d0] sm:$0xff] }
 0x196   :  { %v689_v34 = vpop.permute.xlu2 %688  ;;  %v329_v60 = vpop.permute.xlu0 %328 }
 0x197   :  { %v455_v30 = vmul.f32 %v2063_v62, %v329_v60  ;;  %v2310_v48 = vpop.permute.xlu1 %648  ;;  %v779_v60 = vmul.f32 %v2065_v11, %v677_v25 }
 0x199   :  { %v2315_v49 = vadd.f32 %v776_v28, %v455_v30  ;;  %v912_v30 = vld [vmem:[%s2733_s2 + $0x1c0] sm:$0xff] }
 0x19b   :  { %2783 = vst [vmem:[#allocation48_spill] sm:$0xff] %v2315_v49  ;;  %v913_v49 = vld [vmem:[%s2733_s2 + $0x1c8] sm:$0xff] }
 0x19c   :  { %967 = vperm.xlu0 %1654, %v865_v33   ;;  %v896_v33 = vld [vmem:[%s2733_s2 + $0x140] sm:$0xff] }
 0x19d   :  { %972 = vperm.xlu2 %1656, %v866_v5   ;;  %1212 = vperm.xlu1 %1655, %v914_v27   ;;  %v782_v27 = vmul.f32 %v2065_v11, %v689_v34  ;;  %v881_v34 = vld [vmem:[%s2733_s2 + $0xc8] sm:$0xff] }
 0x19e   :  { %v701_v39 = vpop.permute.xlu2 %700  ;;  %v344_v16 = vpop.permute.xlu0 %343 }
 0x19f   :  { %v458_v42 = vmul.f32 %v2063_v62, %v344_v16  ;;  %v661_v51 = vpop.permute.xlu1 %660 }
 0x1a1   :  { %v2328_v28 = vadd.f32 %v779_v60, %v458_v42  ;;  %v457_v60 = vmul.f32 %v2063_v62, %v2033_v6 }
 0x1a3   :  { %2784 = vst [vmem:[#allocation49_spill] sm:$0xff] %v2328_v28 }
 0x1a4   :  { %1202 = vperm.xlu0 %1654, %v912_v30  }
 0x1a5   :  { %1207 = vperm.xlu2 %1656, %v913_v49   ;;  %1122 = vperm.xlu1 %1655, %v896_v33   ;;  %v895_v49 = vld [vmem:[%s2733_s2 + $0x138] sm:$0xff] }
 0x1a6   :  { %v2336_v25 = vpop.permute.xlu2 %712  ;;  %v359_v5 = vpop.permute.xlu0 %358 }
 0x1a7   :  { %v461_v16 = vmul.f32 %v2063_v62, %v359_v5  ;;  %v673_v42 = vpop.permute.xlu1 %672 }
 0x1a8   :  { %v778_v28 = vmul.f32 %v2065_v11, %v673_v42  ;;  %v785_v42 = vmul.f32 %v2065_v11, %v701_v39  ;;  %v880_v39 = vld [vmem:[%s2733_s2 + $0xc0] sm:$0xff] }
 0x1a9   :  { %v2346_v30 = vadd.f32 %v782_v27, %v461_v16 }
 0x1aa   :  { %v2354_v33 = vadd.f32 %v778_v28, %v457_v60  ;;  %v879_v28 = vld [vmem:[%s2733_s2 + $0xb8] sm:$0xff] }
 0x1ab   :  { %2785 = vst [vmem:[#allocation50_spill] sm:$0xff] %v2346_v30  ;;  %v460_v30 = vmul.f32 %v2063_v62, %v2043_v57  ;;  %v454_v57 = vmul.f32 %v2063_v62, %v2023_v14  ;;  %v863_v14 = vld [vmem:[%s2733_s2 + $0x38] sm:$0xff] }
 0x1ac   :  { %2786 = vst [vmem:[#allocation51_spill] sm:$0xff] %v2354_v33  ;;  %1112 = vperm.xlu0 %1654, %v894_v20   ;;  %v775_v20 = vmul.f32 %v2065_v11, %v661_v51 }
 0x1ad   :  { %1117 = vperm.xlu2 %1656, %v895_v49   ;;  %1047 = vperm.xlu1 %1655, %v881_v34   ;;  %v864_v49 = vld [vmem:[%s2733_s2 + $0x40] sm:$0xff] }
 0x1ae   :  { %v725_v6 = vpop.permute.xlu2 %724  ;;  %v374_v5 = vpop.permute.xlu0 %373 }
 0x1af   :  { %v464_v27 = vmul.f32 %v2063_v62, %v374_v5  ;;  %v685_v16 = vpop.permute.xlu1 %684 }
 0x1b0   :  { %v781_v18 = vmul.f32 %v2065_v11, %v685_v16  ;;  %v463_v16 = vmul.f32 %v2063_v62, %v2053_v38 }
 0x1b1   :  { %v2364_v60 = vadd.f32 %v785_v42, %v464_v27  ;;  %v839_v42 = vadd.f32 %v775_v20, %v454_v57 }
 0x1b2   :  { %v2373_v34 = vadd.f32 %v781_v18, %v460_v30  ;;  %v862_v18 = vld [vmem:[%s2733_s2 + $0x30] sm:$0xff] }
 0x1b4   :  { %2787 = vst [vmem:[#allocation52_spill] sm:$0xff] %v2373_v34  ;;  %1037 = vperm.xlu0 %1654, %v879_v28   ;;  %v911_v28 = vld [vmem:[%s2733_s2 + $0x1b8] sm:$0xff]  ;;  %v772_v34 = vmul.f32 %v2065_v11, %v2310_v48  ;;  %v451_v48 = vmul.f32 %v2063_v62, %v2013_v55  ;;  %v757_v55 = vmul.f32 %v2065_v11, %v2235_v29  ;;  %v890_v29 = vld [vmem:[%s2733_s2 + $0x110] sm:$0xff] }
 0x1b5   :  { %1042 = vperm.xlu2 %1656, %v880_v39   ;;  %962 = vperm.xlu1 %1655, %v864_v49   ;;  %v791_v39 = vmul.f32 %v2065_v11, %v725_v6 }
 0x1b6   :  { %v2377_v5 = vpop.permute.xlu0 %388 }
 0x1b7   :  { %v697_v51 = vpop.permute.xlu1 %696  ;;  %v1158_v27 = vpop.permute.xlu2 %1157 }
 0x1b8   :  { %v784_v33 = vmul.f32 %v2065_v11, %v697_v51  ;;  %v1287_v32 = vadd.f32 %v1158_v27, %v839_v42  ;;  %v909_v42 = vld [vmem:[%s2733_s2 + $0x1a8] sm:$0xff] }
 0x1b9   :  { %v893_v27 = vld [vmem:[%s2733_s2 + $0x128] sm:$0xff] }
 0x1ba   :  { %v1351_v30 = vmax.f32 %v1287_v32, 0.0  ;;  %v2391_v20 = vadd.f32 %v784_v33, %v463_v16  ;;  %v910_v33 = vld [vmem:[%s2733_s2 + $0x1b0] sm:$0xff] }
 0x1bc   :  { %952 = vperm.xlu0 %1654, %v862_v18   ;;  %1423 = vmatpush.msra.mxu2 %v1351_v30 }
 0x1bd   :  { %957 = vperm.xlu2 %1656, %v863_v14   ;;  %1197 = vperm.xlu1 %1655, %v911_v28  }
 0x1be   :  { %v404_v38 = vpop.permute.xlu0 %403 }
 0x1bf   :  { %v470_v49 = vmul.f32 %v2063_v62, %v404_v38  ;;  %v2395_v32 = vpop.permute.xlu1 %708  ;;  %v1238_v57 = vpop.permute.xlu2 %1237  ;;  %v891_v38 = vld [vmem:[%s2733_s2 + $0x118] sm:$0xff] }
 0x1c1   :  { %v855_v51 = vadd.f32 %v791_v39, %v470_v49  ;;  %v892_v39 = vld [vmem:[%s2733_s2 + $0x120] sm:$0xff]  ;;  %v878_v49 = vld [vmem:[%s2733_s2 + $0xb0] sm:$0xff] }
 0x1c3   :  { %v1303_v16 = vadd.f32 %v1238_v57, %v855_v51 }
 0x1c4   :  { %1187 = vperm.xlu0 %1654, %v909_v42  }
 0x1c5   :  { %1192 = vperm.xlu2 %1656, %v910_v33   ;;  %1107 = vperm.xlu1 %1655, %v893_v27   ;;  %v1367_v6 = vmax.f32 %v1303_v16, 0.0 }
 0x1c6   :  { %v923_v18 = vpop.permute.xlu0 %922 }
 0x1c7   :  { %v2407_v30 = vadd.f32 %v923_v18, %v2123_v45  ;;  %v721_v14 = vpop.permute.xlu1 %720  ;;  %v1148_v28 = vpop.permute.xlu2 %1147  ;;  %1443 = vmatpush.msra.mxu3 %v1367_v6  ;;  %v876_v6 = vld [vmem:[%s2733_s2 + $0xa0] sm:$0xff]  ;;  %v453_v18 = vmul.f32 %v2063_v62, %v2055_v37 }
 0x1c8   :  { %v790_v27 = vmul.f32 %v2065_v11, %v721_v14  ;;  %v774_v14 = vmul.f32 %v2065_v11, %v2045_v7  ;;  %v859_v7 = vld [vmem:[%s2733_s2 + $0x18] sm:$0xff] }
 0x1c9   :  { %2788 = vst [vmem:[#allocation53_spill] sm:$0xff] %v2407_v30  ;;  %v1285_v30 = vadd.f32 %v1148_v28, %v2300_v19  ;;  %v908_v19 = vld [vmem:[%s2733_s2 + $0x1a0] sm:$0xff]  ;;  %v759_v28 = vmul.f32 %v2065_v11, %v1995_v0  ;;  %v906_v0 = vld [vmem:[%s2733_s2 + $0x190] sm:$0xff] }
 0x1cc   :  { %1097 = vperm.xlu0 %1654, %v891_v38   ;;  %v877_v38 = vld [vmem:[%s2733_s2 + $0xa8] sm:$0xff] }
 0x1cd   :  { %1102 = vperm.xlu2 %1656, %v892_v39   ;;  %1032 = vperm.xlu1 %1655, %v878_v49   ;;  %v838_v49 = vadd.f32 %v774_v14, %v453_v18  ;;  %v1349_v18 = vmax.f32 %v1285_v30, 0.0  ;;  %v742_v30 = vmul.f32 %v2065_v11, %v2168_v9 }
 0x1ce   :  { %v998_v45 = vpop.permute.xlu0 %997 }
 0x1cf   :  { %v1073_v57 = vpop.permute.xlu2 %1072  ;;  %v928_v42 = vpop.permute.xlu1 %927  ;;  %v1255_v51 = vadd.f32 %v998_v45, %v2163_v12  ;;  %v861_v12 = vld [vmem:[%s2733_s2 + $0x28] sm:$0xff] }
 0x1d0   :  { %v2420_v33 = vadd.f32 %v928_v42, %v2121_v10  ;;  %v469_v10 = vmul.f32 %v2063_v62, %v2078_v15 }
 0x1d1   :  { %v1319_v16 = vmax.f32 %v1255_v51, 0.0 }
 0x1d2   :  { %2789 = vst [vmem:[#allocation54_spill] sm:$0xff] %v2420_v33  ;;  %v854_v39 = vadd.f32 %v790_v27, %v469_v10 }
 0x1d3   :  { %1383 = vmatpush.msra.mxu0 %v1319_v16  ;;  %v438_v16 = vmul.f32 %v2063_v62, %v2007_v50  ;;  %v836_v50 = vadd.f32 %v772_v34, %v451_v48  ;;  %v420_v34 = vmul.f32 %v2063_v62, %v1934_v58  ;;  %v741_v58 = vmul.f32 %v2065_v11, %v1917_v52 }
 0x1d4   :  { %1022 = vperm.xlu0 %1654, %v876_v6   ;;  %v860_v6 = vld [vmem:[%s2733_s2 + $0x20] sm:$0xff]  ;;  %v467_v52 = vmul.f32 %v2063_v62, %v2377_v5 }
 0x1d5   :  { %1027 = vperm.xlu2 %1656, %v877_v38   ;;  %947 = vperm.xlu1 %1655, %v861_v12   ;;  %v823_v38 = vadd.f32 %v759_v28, %v438_v16 }
 0x1d6   :  { %v1233_v37 = vpop.permute.xlu0 %1232 }
 0x1d7   :  { %v1302_v45 = vadd.f32 %v1233_v37, %v854_v39  ;;  %v988_v42 = vpop.permute.xlu2 %987  ;;  %v1153_v51 = vpop.permute.xlu1 %1152  ;;  %v1270_v39 = vadd.f32 %v1073_v57, %v2225_v59  ;;  %v907_v59 = vld [vmem:[%s2733_s2 + $0x198] sm:$0xff]  ;;  %v436_v57 = vmul.f32 %v2063_v62, %v1961_v8 }
 0x1d8   :  { %v1286_v33 = vadd.f32 %v1153_v51, %v838_v49  ;;  %v421_v51 = vmul.f32 %v2063_v62, %v1885_v41  ;;  %v888_v41 = vld [vmem:[%s2733_s2 + $0x100] sm:$0xff] }
 0x1d9   :  { %v1366_v15 = vmax.f32 %v1302_v45, 0.0  ;;  %v1334_v9 = vmax.f32 %v1270_v39, 0.0 }
 0x1da   :  { %v1350_v27 = vmax.f32 %v1286_v33, 0.0 }
 0x1db   :  { %1444 = vmatpush.msra.mxu3 %v1366_v15  ;;  %v821_v15 = vadd.f32 %v757_v55, %v436_v57 }
 0x1dc   :  { %937 = vperm.xlu0 %1654, %v859_v7   ;;  %1424 = vmatpush.msra.mxu2 %v1350_v27  ;;  %v805_v7 = vadd.f32 %v741_v58, %v420_v34  ;;  %v806_v27 = vadd.f32 %v742_v30, %v421_v51  ;;  %v787_v34 = vmul.f32 %v2065_v11, %v2395_v32 }
 0x1dd   :  { %942 = vperm.xlu2 %1656, %v860_v6   ;;  %1182 = vperm.xlu1 %1655, %v908_v19   ;;  %v466_v32 = vmul.f32 %v2063_v62, %v2068_v17  ;;  %v769_v17 = vmul.f32 %v2065_v11, %v2295_v56  ;;  %v756_v56 = vmul.f32 %v2065_v11, %v1985_v2 }
 0x1de   :  { %v1143_v33 = vpop.permute.xlu0 %1142  ;;  %1425 = vmatpush.msra.mxu2 %v1349_v18  ;;  %v1253_v48 = vadd.f32 %v988_v42, %v805_v7  ;;  %v788_v42 = vmul.f32 %v2065_v11, %v2336_v25  ;;  %v904_v25 = vld [vmem:[%s2733_s2 + $0x180] sm:$0xff]  ;;  %v417_v2 = vmul.f32 %v2063_v62, %v1919_v53 }
 0x1df   :  { %v1284_v12 = vadd.f32 %v1143_v33, %v836_v50  ;;  %v1223_v10 = vpop.permute.xlu2 %1222  ;;  %v1078_v14 = vpop.permute.xlu1 %1077  ;;  %v889_v33 = vld [vmem:[%s2733_s2 + $0x108] sm:$0xff] }
 0x1e0   :  { %v1271_v37 = vadd.f32 %v1078_v14, %v823_v38  ;;  %v875_v38 = vld [vmem:[%s2733_s2 + $0x98] sm:$0xff]  ;;  %v852_v14 = vadd.f32 %v788_v42, %v467_v52 }
 0x1e1   :  { %v1348_v49 = vmax.f32 %v1284_v12, 0.0  ;;  %v1317_v12 = vmax.f32 %v1253_v48, 0.0  ;;  %v905_v48 = vld [vmem:[%s2733_s2 + $0x188] sm:$0xff] }
 0x1e2   :  { %v1335_v45 = vmax.f32 %v1271_v37, 0.0 }
 0x1e3   :  { %1426 = vmatpush.msra.mxu2 %v1348_v49  ;;  %v1300_v49 = vadd.f32 %v1223_v10, %v852_v14  ;;  %v771_v10 = vmul.f32 %v2065_v11, %v2035_v4  ;;  %v435_v4 = vmul.f32 %v2063_v62, %v1997_v35 }
 0x1e4   :  { %1172 = vperm.xlu0 %1654, %v906_v0   ;;  %1403 = vmatpush.msra.mxu1 %v1335_v45  ;;  %v450_v45 = vmul.f32 %v2063_v62, %v2047_v63  ;;  %v851_v63 = vadd.f32 %v787_v34, %v466_v32 }
 0x1e5   :  { %1177 = vperm.xlu2 %1656, %v907_v59   ;;  %1092 = vperm.xlu1 %1655, %v890_v29   ;;  %v1364_v29 = vmax.f32 %v1300_v49, 0.0 }
 0x1e6   :  { %v1068_v16 = vpop.permute.xlu0 %1067  ;;  %1404 = vmatpush.msra.mxu1 %v1334_v9  ;;  %v835_v51 = vadd.f32 %v771_v10, %v450_v45 }
 0x1e7   :  { %v1269_v6 = vadd.f32 %v1068_v16, %v821_v15  ;;  %v1133_v19 = vpop.permute.xlu2 %1132  ;;  %v993_v8 = vpop.permute.xlu1 %992 }
 0x1e8   :  { %v1254_v28 = vadd.f32 %v993_v8, %v806_v27  ;;  %v1282_v7 = vadd.f32 %v1133_v19, %v2285_v54  ;;  %v873_v8 = vld [vmem:[%s2733_s2 + $0x88] sm:$0xff]  ;;  %v448_v54 = vmul.f32 %v2063_v62, %v2003_v40  ;;  %v754_v40 = vmul.f32 %v2065_v11, %v2220_v23 }
 0x1e9   :  { %v1333_v18 = vmax.f32 %v1269_v6, 0.0  ;;  %v738_v23 = vmul.f32 %v2065_v11, %v1902_v47 }
 0x1ea   :  { %v1318_v50 = vmax.f32 %v1254_v28, 0.0  ;;  %v1346_v19 = vmax.f32 %v1282_v7, 0.0  ;;  %v833_v35 = vadd.f32 %v769_v17, %v448_v54 }
 0x1eb   :  { %1405 = vmatpush.msra.mxu1 %v1333_v18  ;;  %v820_v18 = vadd.f32 %v756_v56, %v435_v4  ;;  %v432_v4 = vmul.f32 %v2063_v62, %v1987_v26 }
 0x1ec   :  { %1082 = vperm.xlu0 %1654, %v888_v41   ;;  %1384 = vmatpush.msra.mxu0 %v1318_v50 }
 0x1ed   :  { %1087 = vperm.xlu2 %1656, %v889_v33   ;;  %1017 = vperm.xlu1 %1655, %v875_v38  }
 0x1ee   :  { %v983_v5 = vpop.permute.xlu0 %982  ;;  %1385 = vmatpush.msra.mxu0 %v1317_v12  ;;  %v739_v12 = vmul.f32 %v2065_v11, %v2158_v46  ;;  %v802_v46 = vadd.f32 %v738_v23, %v417_v2  ;;  %v2798_v23 = vld [vmem:[#allocation7_spill] sm:$0xff] }
 0x1ef   :  { %v1252_v39 = vadd.f32 %v983_v5, %v2153_v24  ;;  %v1058_v37 = vpop.permute.xlu2 %1057  ;;  %v1228_v55 = vpop.permute.xlu1 %1227  ;;  %v874_v24 = vld [vmem:[%s2733_s2 + $0x90] sm:$0xff]  ;;  %v872_v5 = vld [vmem:[%s2733_s2 + $0x80] sm:$0xff] }
 0x1f0   :  { %v1301_v0 = vadd.f32 %v1228_v55, %v2108_v13  ;;  %v858_v13 = vld [vmem:[%s2733_s2 + $0x10] sm:$0xff]  ;;  %v1267_v33 = vadd.f32 %v1058_v37, %v2210_v31  ;;  %v418_v31 = vmul.f32 %v2063_v62, %v1870_v36 }
 0x1f1   :  { %v1316_v30 = vmax.f32 %v1252_v39, 0.0  ;;  %v433_v39 = vmul.f32 %v2063_v62, %v1945_v61 }
 0x1f2   :  { %v1365_v59 = vmax.f32 %v1301_v0, 0.0  ;;  %v1331_v37 = vmax.f32 %v1267_v33, 0.0  ;;  %v803_v49 = vadd.f32 %v739_v12, %v418_v31  ;;  %v2796_v12 = vld [vmem:[#allocation37_spill] sm:$0xff] }
 0x1f3   :  { %1386 = vmatpush.msra.mxu0 %v1316_v30  ;;  %v818_v53 = vadd.f32 %v754_v40, %v433_v39  ;;  %v2797_v39 = vld [vmem:[#allocation15_spill] sm:$0xff] }
 0x1f4   :  { %1162 = vperm.xlu0 %1654, %v904_v25   ;;  %1445 = vmatpush.msra.mxu3 %v1365_v59  ;;  %v430_v31 = vmul.f32 %v2063_v62, %v2797_v39 }
 0x1f5   :  { %1012 = vperm.xlu2 %1656, %v874_v24   ;;  %932 = vperm.xlu1 %1655, %v858_v13  }
 0x1f6   :  { %v1218_v57 = vpop.permute.xlu0 %1217  ;;  %1446 = vmatpush.msra.mxu3 %v1364_v29 }
 0x1f7   :  { %v1299_v58 = vadd.f32 %v1218_v57, %v851_v63  ;;  %v973_v9 = vpop.permute.xlu2 %972  ;;  %v1138_v15 = vpop.permute.xlu1 %1137  ;;  %v447_v57 = vmul.f32 %v2063_v62, %v2037_v3  ;;  %v766_v3 = vmul.f32 %v2065_v11, %v2280_v1 }
 0x1f8   :  { %v1283_v16 = vadd.f32 %v1138_v15, %v835_v51  ;;  %v1250_v25 = vadd.f32 %v973_v9, %v802_v46 }
 0x1f9   :  { %v1363_v27 = vmax.f32 %v1299_v58, 0.0  ;;  %v768_v58 = vmul.f32 %v2065_v11, %v2025_v22 }
 0x1fa   :  { %v1347_v6 = vmax.f32 %v1283_v16, 0.0  ;;  %v1314_v36 = vmax.f32 %v1250_v25, 0.0 }
 0x1fb   :  { %1447 = vmatpush.msra.mxu3 %v1363_v27 }
 0x1fc   :  { %1427 = vmatpush.msra.mxu2 %v1347_v6  ;;  %v2790_v6 = vld [vmem:[#allocation25_spill] sm:$0xff] }
 0x1fd   :  { %1007 = vperm.xlu2 %1656, %v873_v8   ;;  %1167 = vperm.xlu1 %1655, %v905_v48   ;;  %v445_v8 = vmul.f32 %v2063_v62, %v2790_v6  ;;  %v2791_v48 = vld [vmem:[#allocation22_spill] sm:$0xff] }
 0x1fe   :  { %v1128_v28 = vpop.permute.xlu0 %1127  ;;  %1428 = vmatpush.msra.mxu2 %v1346_v19 }
 0x1ff   :  { %v1281_v41 = vadd.f32 %v1128_v28, %v833_v35  ;;  %v1208_v52 = vpop.permute.xlu2 %1207  ;;  %v1063_v50 = vpop.permute.xlu1 %1062  ;;  %v830_v56 = vadd.f32 %v766_v3, %v445_v8  ;;  %v2805_v8 = vld [vmem:[#allocation46_spill] sm:$0xff] }
 0x200   :  { %v1268_v38 = vadd.f32 %v1063_v50, %v820_v18  ;;  %v1297_v10 = vadd.f32 %v1208_v52, %v2364_v60  ;;  %v2792_v18 = vld [vmem:[#allocation42_spill] sm:$0xff]  ;;  %v2793_v52 = vld [vmem:[#allocation43_spill] sm:$0xff] }
 0x201   :  { %v1345_v42 = vmax.f32 %v1281_v41, 0.0  ;;  %v751_v50 = vmul.f32 %v2065_v11, %v2793_v52 }
 0x202   :  { %v1332_v14 = vmax.f32 %v1268_v38, 0.0  ;;  %v1361_v9 = vmax.f32 %v1297_v10, 0.0  ;;  %v2794_v38 = vld [vmem:[#allocation10_spill] sm:$0xff] }
 0x203   :  { %1429 = vmatpush.msra.mxu2 %v1345_v42  ;;  %v735_v40 = vmul.f32 %v2065_v11, %v2794_v38  ;;  %v2795_v42 = vld [vmem:[#allocation13_spill] sm:$0xff]  ;;  %v815_v46 = vadd.f32 %v751_v50, %v430_v31 }
 0x204   :  { %1406 = vmatpush.msra.mxu1 %v1332_v14  ;;  %v414_v2 = vmul.f32 %v2063_v62, %v2795_v42  ;;  %v736_v14 = vmul.f32 %v2065_v11, %v2796_v12 }
 0x205   :  { %1002 = vperm.xlu1 %1655, %v872_v5  }
 0x206   :  { %v1053_v55 = vpop.permute.xlu0 %1052  ;;  %1407 = vmatpush.msra.mxu1 %v1331_v37  ;;  %v415_v37 = vmul.f32 %v2063_v62, %v2798_v23 }
 0x207   :  { %v1266_v0 = vadd.f32 %v1053_v55, %v818_v53  ;;  %v1118_v34 = vpop.permute.xlu2 %1117  ;;  %v978_v30 = vpop.permute.xlu1 %977  ;;  %v799_v55 = vadd.f32 %v735_v40, %v414_v2  ;;  %v2810_v2 = vld [vmem:[#allocation40_spill] sm:$0xff] }
 0x208   :  { %v1251_v61 = vadd.f32 %v978_v30, %v803_v49 }
 0x209   :  { %v1330_v45 = vmax.f32 %v1266_v0, 0.0  ;;  %v800_v0 = vadd.f32 %v736_v14, %v415_v37  ;;  %v2812_v37 = vld [vmem:[#allocation33_spill] sm:$0xff] }
 0x20a   :  { %v1315_v59 = vmax.f32 %v1251_v61, 0.0 }
 0x20b   :  { %1408 = vmatpush.msra.mxu1 %v1330_v45 }
 0x20c   :  { %1387 = vmatpush.msra.mxu0 %v1315_v59 }
 0x20e   :  { %v968_v24 = vpop.permute.xlu0 %967  ;;  %1388 = vmatpush.msra.mxu0 %v1314_v36 }
 0x20f   :  { %v1249_v47 = vadd.f32 %v968_v24, %v2143_v43  ;;  %v1043_v13 = vpop.permute.xlu2 %1042  ;;  %v1213_v32 = vpop.permute.xlu1 %1212  ;;  %v832_v43 = vadd.f32 %v768_v58, %v447_v57 }
 0x210   :  { %v1298_v29 = vadd.f32 %v1213_v32, %v2100_v21  ;;  %v1279_v21 = vadd.f32 %v1118_v34, %v2270_v44  ;;  %v1264_v41 = vadd.f32 %v1043_v13, %v2792_v18  ;;  %v2799_v13 = vld [vmem:[#allocation35_spill] sm:$0xff] }
 0x211   :  { %v1313_v63 = vmax.f32 %v1249_v47, 0.0 }
 0x212   :  { %v1362_v51 = vmax.f32 %v1298_v29, 0.0  ;;  %v1343_v54 = vmax.f32 %v1279_v21, 0.0  ;;  %v1328_v53 = vmax.f32 %v1264_v41, 0.0  ;;  %v2809_v41 = vld [vmem:[#allocation19_spill] sm:$0xff] }
 0x213   :  { %1389 = vmatpush.msra.mxu0 %v1313_v63  ;;  %v2800_v63 = vld [vmem:[#allocation50_spill] sm:$0xff] }
 0x214   :  { %1448 = vmatpush.msra.mxu3 %v1362_v51  ;;  %v2801_v51 = vld [vmem:[#allocation32_spill] sm:$0xff] }
 0x216   :  { %v1203_v15 = vpop.permute.xlu0 %1202  ;;  %1449 = vmatpush.msra.mxu3 %v1361_v9 }
 0x217   :  { %v1296_v7 = vadd.f32 %v1203_v15, %v2391_v20  ;;  %v958_v16 = vpop.permute.xlu2 %957  ;;  %v1123_v60 = vpop.permute.xlu1 %1122  ;;  %v753_v20 = vmul.f32 %v2065_v11, %v2791_v48  ;;  %v2802_v15 = vld [vmem:[#allocation29_spill] sm:$0xff] }
 0x218   :  { %v1280_v17 = vadd.f32 %v1123_v60, %v832_v43  ;;  %v1247_v61 = vadd.f32 %v958_v16, %v799_v55  ;;  %v444_v43 = vmul.f32 %v2063_v62, %v2802_v15  ;;  %v2803_v16 = vld [vmem:[#allocation27_spill] sm:$0xff] }
 0x219   :  { %v1360_v27 = vmax.f32 %v1296_v7, 0.0  ;;  %v817_v19 = vadd.f32 %v753_v20, %v432_v4  ;;  %v765_v60 = vmul.f32 %v2065_v11, %v2803_v16  ;;  %v2818_v15 = vld [vmem:[#allocation11_spill] sm:$0xff] }
 0x21a   :  { %v1344_v22 = vmax.f32 %v1280_v17, 0.0  ;;  %v1311_v24 = vmax.f32 %v1247_v61, 0.0  ;;  %v2816_v61 = vld [vmem:[#allocation6_spill] sm:$0xff] }
 0x21b   :  { %1450 = vmatpush.msra.mxu3 %v1360_v27  ;;  %v829_v3 = vadd.f32 %v765_v60, %v444_v43  ;;  %v2804_v27 = vld [vmem:[#allocation52_spill] sm:$0xff]  ;;  %v410_v43 = vmul.f32 %v2063_v62, %v2818_v15 }
 0x21c   :  { %1430 = vmatpush.msra.mxu2 %v1344_v22 }
 0x21e   :  { %v1113_v44 = vpop.permute.xlu0 %1112  ;;  %1431 = vmatpush.msra.mxu2 %v1343_v54  ;;  %v2806_v54 = vld [vmem:[#allocation47_spill] sm:$0xff] }
 0x21f   :  { %v1278_v35 = vadd.f32 %v1113_v44, %v830_v56  ;;  %v1193_v1 = vpop.permute.xlu2 %1192  ;;  %v1048_v28 = vpop.permute.xlu1 %1047  ;;  %v763_v56 = vmul.f32 %v2065_v11, %v2806_v54 }
 0x220   :  { %v1265_v26 = vadd.f32 %v1048_v28, %v817_v19  ;;  %v1294_v57 = vadd.f32 %v1193_v1, %v2800_v63  ;;  %v2807_v19 = vld [vmem:[#allocation23_spill] sm:$0xff]  ;;  %v2808_v28 = vld [vmem:[#allocation24_spill] sm:$0xff] }
 0x221   :  { %v1342_v33 = vmax.f32 %v1278_v35, 0.0  ;;  %v429_v35 = vmul.f32 %v2063_v62, %v2807_v19  ;;  %v442_v18 = vmul.f32 %v2063_v62, %v2808_v28  ;;  %v1368_v28 = vld [vmem:[%s2734_s3] sm:$0xff] }
 0x222   :  { %v1329_v5 = vmax.f32 %v1265_v26, 0.0  ;;  %v1358_v21 = vmax.f32 %v1294_v57, 0.0  ;;  %v750_v26 = vmul.f32 %v2065_v11, %v2809_v41  ;;  %v2817_v57 = vld [vmem:[#allocation34_spill] sm:$0xff]  ;;  %1372 = vst [vmem:[#allocation1] ss:$2 sm:$0xff] %v1368_v28  ;;  %v2839_v28 = vld [vmem:[#allocation16_spill] sm:$0xff] }
 0x223   :  { %1432 = vmatpush.msra.mxu2 %v1342_v33  ;;  %v827_v50 = vadd.f32 %v763_v56, %v442_v18 }
 0x224   :  { %1409 = vmatpush.msra.mxu1 %v1329_v5  ;;  %v814_v38 = vadd.f32 %v750_v26, %v429_v35  ;;  %v2811_v5 = vld [vmem:[#allocation41_spill] sm:$0xff]  ;;  %v2823_v26 = vld [vmem:[#allocation51_spill] sm:$0xff] }
 0x225   :  { %v748_v39 = vmul.f32 %v2065_v11, %v2811_v5 }
 0x226   :  { %v1038_v49 = vpop.permute.xlu0 %1037  ;;  %1410 = vmatpush.msra.mxu1 %v1328_v53  ;;  %v732_v53 = vmul.f32 %v2065_v11, %v2812_v37  ;;  %v2828_v37 = vld [vmem:[#allocation17_spill] sm:$0xff] }
 0x227   :  { %v1263_v34 = vadd.f32 %v1038_v49, %v815_v46  ;;  %v1103_v30 = vpop.permute.xlu2 %1102  ;;  %v963_v25 = vpop.permute.xlu1 %962  ;;  %v2813_v46 = vld [vmem:[#allocation36_spill] sm:$0xff] }
 0x228   :  { %v1248_v45 = vadd.f32 %v963_v25, %v800_v0  ;;  %v1276_v48 = vadd.f32 %v1103_v30, %v2805_v8  ;;  %v733_v55 = vmul.f32 %v2065_v11, %v2813_v46  ;;  %v2814_v0 = vld [vmem:[#allocation14_spill] sm:$0xff]  ;;  %v2815_v30 = vld [vmem:[#allocation5_spill] sm:$0xff]  ;;  %v2829_v46 = vld [vmem:[#allocation39_spill] sm:$0xff] }
 0x229   :  { %v1327_v59 = vmax.f32 %v1263_v34, 0.0  ;;  %v427_v34 = vmul.f32 %v2063_v62, %v2814_v0  ;;  %v411_v25 = vmul.f32 %v2063_v62, %v2815_v30 }
 0x22a   :  { %v1312_v36 = vmax.f32 %v1248_v45, 0.0  ;;  %v1340_v52 = vmax.f32 %v1276_v48, 0.0  ;;  %v412_v45 = vmul.f32 %v2063_v62, %v2816_v61  ;;  %v1369_v48 = vld [vmem:[%s2734_s3 + $0x8] sm:$0xff] }
 0x22b   :  { %1411 = vmatpush.msra.mxu1 %v1327_v59  ;;  %1374 = vst [vmem:[#allocation1 + $0x10] ss:$2 sm:$0xff] %v1369_v48 }
 0x22c   :  { %1390 = vmatpush.msra.mxu0 %v1312_v36  ;;  %v812_v36 = vadd.f32 %v748_v39, %v427_v34  ;;  %v2830_v34 = vld [vmem:[#allocation12_spill] sm:$0xff] }
 0x22d   :  { %v424_v30 = vmul.f32 %v2063_v62, %v2830_v34 }
 0x22e   :  { %v953_v47 = vpop.permute.xlu0 %952  ;;  %1391 = vmatpush.msra.mxu0 %v1311_v24  ;;  %v796_v24 = vadd.f32 %v732_v53, %v411_v25  ;;  %v747_v53 = vmul.f32 %v2065_v11, %v2828_v37  ;;  %v1501_v37 = vld [vmem:[%s2735_s4 + $0x90] sm:$0xff] }
 0x22f   :  { %v1246_v32 = vadd.f32 %v953_v47, %v2799_v13  ;;  %v1028_v10 = vpop.permute.xlu2 %1027  ;;  %v1198_v29 = vpop.permute.xlu1 %1197  ;;  %v797_v13 = vadd.f32 %v733_v55, %v412_v45  ;;  %v745_v55 = vmul.f32 %v2065_v11, %v2829_v46  ;;  %v1495_v46 = vld [vmem:[%s2735_s4 + $0x60] sm:$0xff] }
 0x230   :  { %v1295_v58 = vadd.f32 %v1198_v29, %v2801_v51  ;;  %v1261_v12 = vadd.f32 %v1028_v10, %v2810_v2  ;;  %v731_v51 = vmul.f32 %v2065_v11, %v2817_v57 }
 0x231   :  { %v1310_v9 = vmax.f32 %v1246_v32, 0.0 }
 0x232   :  { %v1359_v7 = vmax.f32 %v1295_v58, 0.0  ;;  %v1325_v59 = vmax.f32 %v1261_v12, 0.0  ;;  %v795_v60 = vadd.f32 %v731_v51, %v410_v43  ;;  %v2833_v51 = vld [vmem:[#allocation9_spill] sm:$0xff] }
 0x233   :  { %1392 = vmatpush.msra.mxu0 %v1310_v9 }
 0x234   :  { %1451 = vmatpush.msra.mxu3 %v1359_v7 }
 0x236   :  { %v1188_v17 = vpop.permute.xlu0 %1187  ;;  %1452 = vmatpush.msra.mxu3 %v1358_v21 }
 0x237   :  { %v1293_v4 = vadd.f32 %v1188_v17, %v2804_v27  ;;  %v943_v22 = vpop.permute.xlu2 %942  ;;  %v1108_v6 = vpop.permute.xlu1 %1107  ;;  %v2819_v27 = vld [vmem:[#allocation49_spill] sm:$0xff] }
 0x238   :  { %v1277_v20 = vadd.f32 %v1108_v6, %v829_v3  ;;  %v1244_v29 = vadd.f32 %v943_v22, %v796_v24  ;;  %v2820_v22 = vld [vmem:[#allocation31_spill] sm:$0xff]  ;;  %v2831_v24 = vld [vmem:[#allocation38_spill] sm:$0xff] }
 0x239   :  { %v1357_v44 = vmax.f32 %v1293_v4, 0.0 }
 0x23a   :  { %v1341_v1 = vmax.f32 %v1277_v20, 0.0  ;;  %v1308_v16 = vmax.f32 %v1244_v29, 0.0  ;;  %v2821_v20 = vld [vmem:[#allocation28_spill] sm:$0xff] }
 0x23b   :  { %1453 = vmatpush.msra.mxu3 %v1357_v44  ;;  %v441_v54 = vmul.f32 %v2063_v62, %v2821_v20  ;;  %v2822_v44 = vld [vmem:[#allocation26_spill] sm:$0xff]  ;;  %v1377_v29 = vld.sshfl [vmem:[#allocation1 + $0x10] sm:$0xff pattern:$0x75316420] }
 0x23c   :  { %1433 = vmatpush.msra.mxu2 %v1341_v1  ;;  %v762_v19 = vmul.f32 %v2065_v11, %v2822_v44  ;;  %v2836_v20 = vld [vmem:[#allocation48_spill] sm:$0xff] }
 0x23e   :  { %v1098_v33 = vpop.permute.xlu0 %1097  ;;  %1434 = vmatpush.msra.mxu2 %v1340_v52  ;;  %v826_v41 = vadd.f32 %v762_v19, %v441_v54  ;;  %v2838_v19 = vld [vmem:[#allocation18_spill] sm:$0xff] }
 0x23f   :  { %v1275_v40 = vadd.f32 %v1098_v33, %v827_v50  ;;  %v1033_v42 = vpop.permute.xlu1 %1032  ;;  %v1178_v23 = vpop.permute.xlu2 %1177  ;;  %v2824_v33 = vld [vmem:[#allocation44_spill] sm:$0xff] }
 0x240   :  { %v1262_v14 = vadd.f32 %v1033_v42, %v814_v38  ;;  %v1291_v4 = vadd.f32 %v1178_v23, %v2819_v27  ;;  %v2825_v42 = vld [vmem:[#allocation45_spill] sm:$0xff] }
 0x241   :  { %v1339_v31 = vmax.f32 %v1275_v40, 0.0  ;;  %v760_v2 = vmul.f32 %v2065_v11, %v2825_v42  ;;  %v1509_v42 = vld [vmem:[%s2735_s4 + $0xd0] sm:$0x1] }
 0x242   :  { %v1326_v49 = vmax.f32 %v1262_v14, 0.0  ;;  %v1355_v35 = vmax.f32 %v1291_v4, 0.0  ;;  %v2826_v14 = vld [vmem:[#allocation20_spill] sm:$0xff] }
 0x243   :  { %1435 = vmatpush.msra.mxu2 %v1339_v31  ;;  %v426_v5 = vmul.f32 %v2063_v62, %v2826_v14  ;;  %v2827_v31 = vld [vmem:[#allocation21_spill] sm:$0xff]  ;;  %v1504_v14 = vld [vmem:[%s2735_s4 + $0xa8] sm:$0xff] }
 0x244   :  { %1412 = vmatpush.msra.mxu1 %v1326_v49  ;;  %v439_v23 = vmul.f32 %v2063_v62, %v2827_v31  ;;  %v1499_v31 = vld [vmem:[%s2735_s4 + $0x80] sm:$0xff] }
 0x245   :  { %v811_v61 = vadd.f32 %v747_v53, %v426_v5  ;;  %v1505_v5 = vld [vmem:[%s2735_s4 + $0xb0] sm:$0xff]  ;;  %v1502_v53 = vld [vmem:[%s2735_s4 + $0x98] sm:$0xff] }
 0x246   :  { %v1023_v47 = vpop.permute.xlu0 %1022  ;;  %1413 = vmatpush.msra.mxu1 %v1325_v59  ;;  %v824_v0 = vadd.f32 %v760_v2, %v439_v23  ;;  %v1510_v2 = vld [vmem:[%s2735_s4 + $0xd8] sm:$0x1]  ;;  %v1500_v23 = vld [vmem:[%s2735_s4 + $0x88] sm:$0xff] }
 0x247   :  { %v1260_v32 = vadd.f32 %v1023_v47, %v812_v36  ;;  %v948_v10 = vpop.permute.xlu1 %947  ;;  %v1088_v7 = vpop.permute.xlu2 %1087 }
 0x248   :  { %v1245_v63 = vadd.f32 %v948_v10, %v797_v13  ;;  %v1273_v38 = vadd.f32 %v1088_v7, %v2824_v33  ;;  %v809_v13 = vadd.f32 %v745_v55, %v424_v30  ;;  %v1496_v55 = vld [vmem:[%s2735_s4 + $0x68] sm:$0xff]  ;;  %v1491_v30 = vld [vmem:[%s2735_s4 + $0x40] sm:$0xff] }
 0x249   :  { %v1324_v58 = vmax.f32 %v1260_v32, 0.0 }
 0x24a   :  { %v1309_v9 = vmax.f32 %v1245_v63, 0.0  ;;  %v1337_v49 = vmax.f32 %v1273_v38, 0.0  ;;  %v2832_v63 = vld [vmem:[#allocation8_spill] sm:$0xff] }
 0x24b   :  { %1414 = vmatpush.msra.mxu1 %v1324_v58  ;;  %v730_v57 = vmul.f32 %v2065_v11, %v2832_v63  ;;  %v409_v58 = vmul.f32 %v2063_v62, %v2833_v51  ;;  %v1483_v63 = vld [vmem:[%s2735_s4] sm:$0xff] }
 0x24c   :  { %1393 = vmatpush.msra.mxu0 %v1309_v9 }
 0x24e   :  { %v938_v21 = vpop.permute.xlu0 %937  ;;  %1394 = vmatpush.msra.mxu0 %v1308_v16  ;;  %v794_v16 = vadd.f32 %v730_v57, %v409_v58  ;;  %v1484_v57 = vld [vmem:[%s2735_s4 + $0x8] sm:$0xff]  ;;  %v1485_v58 = vld [vmem:[%s2735_s4 + $0x10] sm:$0xff] }
 0x24f   :  { %v1243_v17 = vadd.f32 %v938_v21, %v795_v60  ;;  %v1183_v3 = vpop.permute.xlu1 %1182  ;;  %v1013_v1 = vpop.permute.xlu2 %1012 }
 0x250   :  { %v1292_v6 = vadd.f32 %v1183_v3, %v2820_v22  ;;  %v1258_v47 = vadd.f32 %v1013_v1, %v2831_v24  ;;  %v2834_v3 = vld [vmem:[#allocation54_spill] sm:$0xff]  ;;  %v2835_v22 = vld [vmem:[#allocation53_spill] sm:$0xff] }
 0x251   :  { %v1307_v8 = vmax.f32 %v1243_v17, 0.0  ;;  %v1305_v27 = vmax.f32 %v2834_v3, 0.0  ;;  %v1487_v24 = vld [vmem:[%s2735_s4 + $0x20] sm:$0xff] }
 0x252   :  { %v1356_v56 = vmax.f32 %v1292_v6, 0.0  ;;  %v1322_v43 = vmax.f32 %v1258_v47, 0.0  ;;  %v1304_v6 = vmax.f32 %v2835_v22, 0.0  ;;  %v1488_v47 = vld [vmem:[%s2735_s4 + $0x28] sm:$0xff] }
 0x253   :  { %1395 = vmatpush.msra.mxu0 %v1307_v8  ;;  %v1375_v8 = vld.sshfl [vmem:[#allocation1] sm:$0xff pattern:$0x75316420] }
 0x254   :  { %1454 = vmatpush.msra.mxu3 %v1356_v56  ;;  %v2837_v56 = vld [vmem:[#allocation30_spill] sm:$0xff] }
 0x256   :  { %v1173_v18 = vpop.permute.xlu0 %1172  ;;  %1455 = vmatpush.msra.mxu3 %v1355_v35  ;;  %v423_v35 = vmul.f32 %v2063_v62, %v2838_v19  ;;  %v1507_v62 = vld [vmem:[%s2735_s4 + $0xc0] sm:$0x1] }
 0x257   :  { %v1290_v52 = vadd.f32 %v1173_v18, %v2823_v26  ;;  %v1093_v50 = vpop.permute.xlu1 %1092  ;;  %v1008_v45 = vpop.permute.xlu2 %1007  ;;  %v744_v18 = vmul.f32 %v2065_v11, %v2839_v28  ;;  %v1378_v26 = vld.sshfl [vmem:[#allocation1 + $0x18] sm:$0xff pattern:$0x75316420]  ;;  %v1508_v11 = vld [vmem:[%s2735_s4 + $0xc8] sm:$0x1] }
 0x258   :  { %v1274_v40 = vadd.f32 %v1093_v50, %v826_v41  ;;  %v1257_v9 = vadd.f32 %v1008_v45, %v809_v13  ;;  %v1494_v45 = vld [vmem:[%s2735_s4 + $0x58] sm:$0xff] }
 0x259   :  { %v1354_v12 = vmax.f32 %v1290_v52, 0.0  ;;  %v808_v52 = vadd.f32 %v744_v18, %v423_v35 }
 0x25a   :  { %v1338_v39 = vmax.f32 %v1274_v40, 0.0  ;;  %v1321_v7 = vmax.f32 %v1257_v9, 0.0  ;;  %v1376_v40 = vld.sshfl [vmem:[#allocation1 + $0x8] sm:$0xff pattern:$0x75316420]  ;;  %v1486_v9 = vld [vmem:[%s2735_s4 + $0x18] sm:$0xff] }
 0x25b   :  { %1456 = vmatpush.msra.mxu3 %v1354_v12  ;;  %v1503_v12 = vld [vmem:[%s2735_s4 + $0xa0] sm:$0xff] }
 0x25c   :  { %1436 = vmatpush.msra.mxu2 %v1338_v39  ;;  %v1506_v39 = vld [vmem:[%s2735_s4 + $0xb8] sm:$0xff] }
 0x25e   :  { %v1083_v25 = vpop.permute.xlu0 %1082  ;;  %1437 = vmatpush.msra.mxu2 %v1337_v49  ;;  %v1497_v49 = vld [vmem:[%s2735_s4 + $0x70] sm:$0xff] }
 0x25f   :  { %v1272_v59 = vadd.f32 %v1083_v25, %v824_v0  ;;  %v1018_v36 = vpop.permute.xlu1 %1017  ;;  %v1498_v0 = vld [vmem:[%s2735_s4 + $0x78] sm:$0xff]  ;;  %v1492_v25 = vld [vmem:[%s2735_s4 + $0x48] sm:$0xff] }
 0x260   :  { %v1259_v32 = vadd.f32 %v1018_v36, %v811_v61  ;;  %v1493_v61 = vld [vmem:[%s2735_s4 + $0x50] sm:$0xff] }
 0x261   :  { %v1336_v10 = vmax.f32 %v1272_v59, 0.0 }
 0x262   :  { %v1323_v15 = vmax.f32 %v1259_v32, 0.0  ;;  %v1489_v32 = vld [vmem:[%s2735_s4 + $0x30] sm:$0xff] }
 0x263   :  { %1438 = vmatpush.msra.mxu2 %v1336_v10  ;;  %v1490_v10 = vld [vmem:[%s2735_s4 + $0x38] sm:$0xff]  ;;  %s1689_s4 = smov [#allocation2]  }
 0x264   :  { %1415 = vmatpush.msra.mxu1 %v1323_v15  ;;  %1439 = vmatmul.f32.vlgmr.msra.gmra.mxu2 %v1377_v29  ;;  %s1626_s16 = sshll.u32 %s1689_s4, 4  ;;  %s1627_s16 = int_to_ptr.vmem [resolvable:$true] %s1626_s16 }
 0x265   :  { %1642 = vmatpush.msk.msrb.mxu2 %vm1515_vm0, %v1509_v42 }
 0x266   :  { %1416 = vmatpush.msra.mxu1 %v1322_v43  ;;  %v1163_v4 = vpop.permute.xlu0 %1162 }
 0x267   :  { %v933_v60 = vpop.permute.xlu1 %932  ;;  %v1288_v54 = vadd.f32 %v1163_v4, %v2836_v20  ;;  %1578 = vmatpush.msrb.mxu2 %v1505_v5 }
 0x268   :  { %v1242_v21 = vadd.f32 %v933_v60, %v794_v16  ;;  %1417 = vmatpush.msra.mxu1 %v1321_v7 }
 0x269   :  { %v1352_v41 = vmax.f32 %v1288_v54, 0.0  ;;  %1579 = vmatpush.msrb.mxu2 %v1501_v37 }
 0x26a   :  { %v1306_v17 = vmax.f32 %v1242_v21, 0.0 }
 0x26b   :  { %1580 = vmatpush.msrb.mxu2 %v1497_v49 }
 0x26c   :  { %1396 = vmatpush.msra.mxu0 %v1306_v17 }
 0x26d   :  { %1581 = vmatpush.msrb.mxu2 %v1493_v61 }
 0x26e   :  { %1397 = vmatpush.msra.mxu0 %v1305_v27 }
 0x26f   :  { %v1168_v48 = vpop.permute.xlu1 %1167  ;;  %1582 = vmatpush.msrb.mxu2 %v1489_v32 }
 0x270   :  { %v1289_v44 = vadd.f32 %v1168_v48, %v2837_v56  ;;  %1398 = vmatpush.msra.mxu0 %v1304_v6 }
 0x271   :  { %1399 = vmatmul.f32.vlgmr.msra.gmra.mxu0 %v1375_v8  ;;  %1583 = vmatpush.msrb.mxu2 %v1485_v58 }
 0x272   :  { %v1353_v1 = vmax.f32 %v1289_v44, 0.0  ;;  %1638 = vmatpush.msk.msrb.mxu0 %vm1515_vm0, %v1507_v62 }
 0x274   :  { %1457 = vmatpush.msra.mxu3 %v1353_v1  ;;  %1538 = vmatpush.msrb.mxu0 %v1503_v12 }
 0x276   :  { %1458 = vmatpush.msra.mxu3 %v1352_v41  ;;  %1539 = vmatpush.msrb.mxu0 %v1499_v31 }
 0x277   :  { %v1003_v50 = vpop.permute.xlu1 %1002  ;;  %1459 = vmatmul.f32.vlgmr.msra.gmra.mxu3 %v1378_v26 }
 0x278   :  { %v1256_v33 = vadd.f32 %v1003_v50, %v808_v52  ;;  %1644 = vmatpush.msk.msrb.mxu3 %vm1515_vm0, %v1510_v2  ;;  %1540 = vmatpush.msrb.mxu0 %v1495_v46 }
 0x27a   :  { %v1320_v38 = vmax.f32 %v1256_v33, 0.0  ;;  %1598 = vmatpush.msrb.mxu3 %v1506_v39  ;;  %1541 = vmatpush.msrb.mxu0 %v1491_v30 }
 0x27c   :  { %1418 = vmatpush.msra.mxu1 %v1320_v38  ;;  %1599 = vmatpush.msrb.mxu3 %v1502_v53 }
 0x27d   :  { %1419 = vmatmul.f32.vlgmr.msra.gmra.mxu1 %v1376_v40  ;;  %1542 = vmatpush.msrb.mxu0 %v1487_v24 }
 0x27e   :  { %1640 = vmatpush.msk.msrb.mxu1 %vm1515_vm0, %v1508_v11  ;;  %1600 = vmatpush.msrb.mxu3 %v1498_v0 }
 0x27f   :  { %1543 = vmatpush.msrb.mxu0 %v1483_v63 }
 0x280   :  { %1558 = vmatpush.msrb.mxu1 %v1504_v14  ;;  %1601 = vmatpush.msrb.mxu3 %v1494_v45 }
 0x282   :  { %1559 = vmatpush.msrb.mxu1 %v1500_v23  ;;  %1602 = vmatpush.msrb.mxu3 %v1490_v10 }
 0x284   :  { %1560 = vmatpush.msrb.mxu1 %v1496_v55  ;;  %1603 = vmatpush.msrb.mxu3 %v1486_v9 }
 0x286   :  { %1561 = vmatpush.msrb.mxu1 %v1492_v25 }
 0x288   :  { %1562 = vmatpush.msrb.mxu1 %v1488_v47 }
 0x28a   :  { %1563 = vmatpush.msrb.mxu1 %v1484_v57 }
 0x2e7   :  { %v1440_v36 = vpop.f32.mrf.mxu2 }
 0x2ee   :  { %v1400_v34 = vpop.f32.mrf.mxu0 }
 0x2fa   :  { %v1420_v59 = vpop.f32.mrf.mxu1  ;;  %v1460_v29 = vpop.f32.mrf.mxu3 }
 0x2fb   :  { %v1421_v13 = vadd.f32 %v1420_v59, %v1400_v34 }
 0x2fd   :  { %v1441_v51 = vadd.f32 %v1440_v36, %v1421_v13 }
 0x2ff   :  { %v1461_v15 = vadd.f32 %v1460_v29, %v1441_v51 }
 0x301   :  { %v1637_v43 = vmul.f32 -1.442695, %v1461_v15 }
 0x303   :  { %1657 = vpow2.f32 %v1637_v43 }
 0x309   :  { %v1658_v7 = vpop.eup %1657 }
 0x30a   :  { %v1466_v16 = vadd.f32 1.0, %v1658_v7 }
 0x30c   :  { %1659 = vrcp.f32 %v1466_v16  ;;  %v1478_v3 = vand.u32 2147483648, %v1466_v16  ;;  %v1476_v4 = vand.u32 2147483647, %v1466_v16  ;;  %vm1472_vm2 = vweird.f32 %v1466_v16 }
 0x30e   :  { %v1479_v6 = vor.u32 1.1754944e-38, %v1478_v3  ;;  %vm1477_vm4 = vcmp.eq.f32.partialorder %v1476_v4, 8.507059e+37 }
 0x312   :  { %v1660_v60 = vpop.eup %1659 }
 0x313   :  { %v1468_v21 = vmul.f32 %v1660_v60, %v1466_v16  ;;  %vm1473_vm1 = vweird.f32 %v1660_v60 }
 0x314   :  { %vm1474_vm3 = vmor %vm1472_vm2, %vm1473_vm1 }
 0x315   :  { %v1469_v17 = vsub.f32 1.0, %v1468_v21 }
 0x317   :  { %v1470_v27 = vmul.f32 %v1660_v60, %v1469_v17 }
 0x319   :  { %v1471_v22 = vadd.f32 %v1660_v60, %v1470_v27 }
 0x31b   :  { %v1475_v8 = vsel %vm1474_vm3, %v1660_v60, %v1471_v22 }
 0x31c   :  { %v1480_v48 = vsel %vm1477_vm4, %v1479_v6, %v1475_v8 }
 0x31d   :  { %v1482_v20 = vmul.f32 16.0, %v1480_v48 }
 0x31f   :  { %1639 = vmatmul.msk.f32.vlgmr.msrb.gmra.mxu0 %vm1511_vm5, %v1482_v20  ;;  %1641 = vmatmul.msk.f32.vlgmr.msrb.gmra.mxu1 %vm1511_vm5, %v1482_v20 }
 0x320   :  { %1643 = vmatmul.msk.f32.vlgmr.msrb.gmra.mxu2 %vm1511_vm5, %v1482_v20  ;;  %1645 = vmatmul.msk.f32.vlgmr.msrb.gmra.mxu3 %vm1511_vm5, %v1482_v20 }
 0x39c   :  { %v1565_v54 = vpop.f32.mrf.mxu1  ;;  %v1545_v44 = vpop.f32.mrf.mxu0 }
 0x39d   :  { %v1612_v56 = vrot.slane %v1565_v54, 4 }
 0x39f   :  { %v1615_v19 = vsel %vm1614_vm6, %v1545_v44, %v1612_v56 }
 0x3a0   :  { %1619 = vst [vmem:[#allocation2] sm:$0xff] %v1615_v19 }
 0x3a3   :  { %v1605_v35 = vpop.f32.mrf.mxu3  ;;  %v1585_v28 = vpop.f32.mrf.mxu2 }
 0x3a4   :  { %v1613_v1 = vrot.slane %v1605_v35, 4 }
 0x3a6   :  { %v1616_v18 = vsel %vm1614_vm6, %v1585_v28, %v1613_v1 }
 0x3a7   :  { %1620 = vst [vmem:[#allocation2 + $0x8] sm:$0xff] %v1616_v18 }
 0x3a8   :  { %1631 = dma.vmem_to_hbm [thread:$0]  %s1627_s16, 256, %s1629_s18, [#allocation3]  }
 0x3a9   :  { %1685 = dma.done.wait [#allocation3], 256  }
 0x3aa   :  { %1686 = vsyncadd [#allocation3], 4294967040 }
 0x3ab   :  { %1636 = vsyncpa [#allocation3], 1 }

</bundles_post_ra>
